<compile_context>
chip_gen: v7x
topology: tpu7x:2x2x1
jax: 0.10.0
libtpu: 0.0.40
codegen_flags: <defaults>
</compile_context>

<pallas_src>
import jax
import jax.numpy as jnp
from jax.experimental import pallas as pl
from jax.experimental.pallas import tpu as pltpu

_LANE = 128


def _autoencoder_kernel(x_ref,
                        w1_ref, b1_ref,
                        w23_ref, b23_ref,
                        w4_ref, b4_ref,
                        o_ref):
    """Fused 3-matmul autoencoder forward for one batch tile.

    x arrives f32 and is cast to the weight compute dtype in-kernel (hidden under
    the DMA).  Accumulation, bias add and ReLU stay f32 (important on v5e which
    has no bf16 VPU); the output slab is lane-dense (E padded to 128).
    """
    cdt = w1_ref.dtype

    x = x_ref[...].astype(cdt)  # (block_b, E)

    # encoder: Linear(E -> H) + ReLU
    h1 = jnp.dot(x, w1_ref[...], preferred_element_type=jnp.float32) + b1_ref[...]
    h1 = jnp.maximum(h1, 0.0).astype(cdt)

    # folded bottleneck: Linear(H -> Bn) -> Linear(Bn -> H), then decoder ReLU
    h2 = jnp.dot(h1, w23_ref[...], preferred_element_type=jnp.float32) + b23_ref[...]
    h2 = jnp.maximum(h2, 0.0).astype(cdt)

    # decoder: Linear(H -> E_pad)  (columns >= E are exact zeros)
    y = jnp.dot(h2, w4_ref[...], preferred_element_type=jnp.float32) + b4_ref[...]

    o_ref[...] = y.astype(o_ref.dtype)


def _num_tensorcores():
    """Best-effort TC-per-chip query (2 on v7x, 1 on v5e/v6e); never raises."""
    try:
        info = pltpu.get_tpu_info()
        for attr in ("num_cores", "core_count", "tensorcores_per_chip", "num_tensorcores"):
            v = getattr(info, attr, None)
            if v:
                return max(1, int(v))
    except Exception:
        pass
    try:
        v = getattr(jax.devices()[0], "num_cores", None)
        if v:
            return max(1, int(v))
    except Exception:
        pass
    return 1


def _physical_vmem_bytes():
    try:
        info = pltpu.get_tpu_info()
        return max(int(getattr(info, "vmem_capacity_bytes", 64 << 20)), 32 << 20)
    except Exception:
        return 64 << 20  # conservative (v7x per-TC VMEM)


def _per_row_vmem_bytes(E, E_pad, H, compute_dtype, out_dtype):
    c = jnp.dtype(compute_dtype).itemsize
    o = jnp.dtype(out_dtype).itemsize
    # double-buffered f32 x tile + double-buffered out tile + f32/bf16 intermediates
    return 2 * E * 4 + 2 * E_pad * o + E * c + 2 * H * 4 + 2 * H * c + E_pad * 4


def _weight_vmem_bytes(E, E_pad, H, compute_dtype):
    c = jnp.dtype(compute_dtype).itemsize
    w = (E * H + H * H + H * E_pad) * c + (H + H + E_pad) * 4
    return 2 * w  # default double-buffered (constant index map, so never re-DMA'd)


def _select_block_b(B, E, E_pad, H, compute_dtype, out_dtype, num_cores):
    """Largest multiple-of-8 divisor of B that fits VMEM, one tile per TensorCore."""
    per_row = _per_row_vmem_bytes(E, E_pad, H, compute_dtype, out_dtype)
    fixed = _weight_vmem_bytes(E, E_pad, H, compute_dtype)
    budget = 24 << 20  # stay well under the default scoped-VMEM limit
    max_rows = max(8, (budget - fixed) // per_row)
    target = pl.cdiv(B, max(1, num_cores))  # one grid step per TensorCore if possible
    cap = min(max_rows, 2048, target)
    if B <= cap:
        return B
    bb = (cap // 8) * 8
    while bb >= 8:
        if B % bb == 0:
            return bb
        bb -= 8
    return B  # odd batch: fall back to a single whole-batch tile


def _vmem_limit_bytes(block_b, E, E_pad, H, compute_dtype, out_dtype):
    est = (_weight_vmem_bytes(E, E_pad, H, compute_dtype)
           + block_b * _per_row_vmem_bytes(E, E_pad, H, compute_dtype, out_dtype))
    phys = _physical_vmem_bytes()
    # 2x headroom over the honest estimate, floored for compiler-internal scratch,
    # clamped to 75% of physical VMEM (keeps headroom on v7x's 64 MiB/TC).
    return int(min(max(2 * est, 16 << 20), int(0.75 * phys)))


def prepare_params(params, *, compute_dtype=jnp.bfloat16):
    """One-time (outside the hot path) param prep: fold bottleneck, pad, cast.

    params: dict with w1..w4 as (in, out) f32 and b1..b4 as (1, out) f32.
    Returns the kernel-ready dict {w1,b1,w23,b23,w4,b4}.
    """
    E, H = params["w1"].shape
    E_pad = pl.cdiv(E, _LANE) * _LANE

    w23 = params["w2"] @ params["w3"]                       # (H, H), composed in f32
    b23 = params["b2"] @ params["w3"] + params["b3"]        # (1, H)

    w4 = params["w4"]
    b4 = params["b4"]
    if E_pad != E:  # lane-dense output: zero-pad out-features to a 128 multiple
        w4 = jnp.pad(w4, ((0, 0), (0, E_pad - E)))
        b4 = jnp.pad(b4, ((0, 0), (0, E_pad - E)))

    return {
        "w1": params["w1"].astype(compute_dtype), "b1": params["b1"].astype(jnp.float32),
        "w23": w23.astype(compute_dtype), "b23": b23.astype(jnp.float32),
        "w4": w4.astype(compute_dtype), "b4": b4.astype(jnp.float32),
    }


def embedding_autoencoder_forward(x, prepared, *, block_b=None, out_dtype=None):
    """Run the fused autoencoder kernel.

    x: (B, E) float32; prepared: output of prepare_params().
    """
    B, E = x.shape
    H = prepared["w1"].shape[1]
    E_pad = prepared["w4"].shape[1]
    compute_dtype = prepared["w1"].dtype
    if out_dtype is None:
        out_dtype = x.dtype

    num_cores = _num_tensorcores()
    if block_b is None:
        block_b = _select_block_b(B, E, E_pad, H, compute_dtype, out_dtype, num_cores)
    assert B % block_b == 0, "batch must be divisible by batch tile"
    assert block_b == B or block_b % 8 == 0, "batch tile must be a multiple of 8 sublanes"

    grid = (B // block_b,)
    x_spec = pl.BlockSpec((block_b, E), lambda i: (i, 0))
    o_spec = pl.BlockSpec((block_b, E_pad), lambda i: (i, 0))

    def full_spec(arr):
        # Constant block index -> tile stays resident in VMEM across grid steps.
        return pl.BlockSpec(arr.shape, lambda i: (0, 0))

    w1, b1 = prepared["w1"], prepared["b1"]
    w23, b23 = prepared["w23"], prepared["b23"]
    w4, b4 = prepared["w4"], prepared["b4"]
    in_specs = [x_spec,
                full_spec(w1), full_spec(b1),
                full_spec(w23), full_spec(b23),
                full_spec(w4), full_spec(b4)]

    c = jnp.dtype(compute_dtype).itemsize
    flops = 2 * B * (E * H + H * H + H * E_pad)
    bytes_accessed = (B * E * x.dtype.itemsize
                      + (E * H + H * H + H * E_pad) * c + (H + H + E_pad) * 4
                      + B * E_pad * jnp.dtype(out_dtype).itemsize)

    out_padded = pl.pallas_call(
        _autoencoder_kernel,
        out_shape=jax.ShapeDtypeStruct((B, E_pad), out_dtype),
        grid_spec=pltpu.PrefetchScalarGridSpec(
            num_scalar_prefetch=0,
            grid=grid,
            in_specs=in_specs,
            out_specs=o_spec,
        ),
        compiler_params=pltpu.CompilerParams(
            dimension_semantics=("parallel",),
            vmem_limit_bytes=_vmem_limit_bytes(block_b, E, E_pad, H,
                                               compute_dtype, out_dtype),
        ),
        cost_estimate=pl.CostEstimate(flops=flops, transcendentals=0,
                                      bytes_accessed=bytes_accessed),
    )(x, w1, b1, w23, b23, w4, b4)

    return out_padded[:, :E] if E_pad != E else out_padded


def init_params(key, embedding_dim, hidden_dim, bottleneck_dim):
    """Deterministic init mimicking PyTorch's default Linear init U[-1/sqrt(fan_in), ...]."""
    dims = [
        (embedding_dim, hidden_dim),      # encoder.0
        (hidden_dim, bottleneck_dim),     # encoder.2
        (bottleneck_dim, hidden_dim),     # decoder.0
        (hidden_dim, embedding_dim),      # decoder.2
    ]
    params = {}
    keys = jax.random.split(key, 2 * len(dims))
    for idx, (fan_in, fan_out) in enumerate(dims):
        bound = 1.0 / jnp.sqrt(jnp.float32(fan_in))
        w = jax.random.uniform(keys[2 * idx], (fan_in, fan_out),
                               dtype=jnp.float32, minval=-bound, maxval=bound)
        b = jax.random.uniform(keys[2 * idx + 1], (1, fan_out),
                               dtype=jnp.float32, minval=-bound, maxval=bound)
        params[f"w{idx + 1}"] = w
        params[f"b{idx + 1}"] = b
    return params


def reference_forward(x, params):
    """Pure-f32 JAX reference of the PyTorch module's forward pass."""
    h1 = jnp.maximum(x @ params["w1"] + params["b1"], 0.0)
    z = h1 @ params["w2"] + params["b2"]
    h2 = jnp.maximum(z @ params["w3"] + params["b3"], 0.0)
    return h2 @ params["w4"] + params["b4"]


def reference_forward_matched(x, params, compute_dtype):
    """Reference with the kernel's exact numerics (bf16 operands, f32 accumulate,
    f32-composed bottleneck fold)."""
    cdt = compute_dtype
    w1 = params["w1"].astype(cdt)
    b1 = params["b1"].astype(jnp.float32)
    w23 = (params["w2"] @ params["w3"]).astype(cdt)
    b23 = (params["b2"] @ params["w3"] + params["b3"]).astype(jnp.float32)
    w4 = params["w4"].astype(cdt)
    b4 = params["b4"].astype(jnp.float32)

    xw = x.astype(cdt)
    h1 = jnp.maximum(jnp.dot(xw, w1, preferred_element_type=jnp.float32) + b1, 0.0).astype(cdt)
    h2 = jnp.maximum(jnp.dot(h1, w23, preferred_element_type=jnp.float32) + b23, 0.0).astype(cdt)
    return jnp.dot(h2, w4, preferred_element_type=jnp.float32) + b4


if __name__ == "__main__":
    # Small, module-consistent shapes.  The whole batch fits VMEM, so the grid is
    # (1,) on single-TC chips and (2,) (one tile per TensorCore) on v7x.
    batch = 1024
    embedding_dim = 32
    hidden_dim = 64
    bottleneck_dim = 16

    key = jax.random.PRNGKey(0)
    key_x, key_p = jax.random.split(key)

    x = jax.random.normal(key_x, (batch, embedding_dim), dtype=jnp.float32)
    params = init_params(key_p, embedding_dim, hidden_dim, bottleneck_dim)

    prepared = prepare_params(params)                     # one-time fold / pad / cast
    out = embedding_autoencoder_forward(x, prepared)
    out = jax.block_until_ready(out)
    assert out.shape == (batch, embedding_dim)

    # Tight check against a reference using identical bf16/f32 mixed precision.
    ref_matched = reference_forward_matched(x, params, jnp.bfloat16)
    assert jnp.allclose(out, ref_matched, atol=2e-3, rtol=2e-3), \
        "kernel mismatch vs matched-precision reference"

    # Loose check against the pure-f32 PyTorch-equivalent forward.  The 1e-1
    # tolerance is expected bf16 operand-rounding headroom, not a bug margin.
    ref_f32 = reference_forward(x, params)
    assert jnp.allclose(out, ref_f32, atol=1e-1, rtol=1e-1), \
        "kernel mismatch vs f32 reference"

    print("KERNEL_OK")
</pallas_src>

<mosaic_0001>
module attributes {stable_mosaic.version = 11 : i64} {
  func.func @_autoencoder_kernel(%arg0: i32, %arg1: memref<1024x32xf32, #tpu.memory_space<vmem>>, %arg2: memref<32x64xbf16, #tpu.memory_space<vmem>>, %arg3: memref<1x64xf32, #tpu.memory_space<vmem>>, %arg4: memref<64x64xbf16, #tpu.memory_space<vmem>>, %arg5: memref<1x64xf32, #tpu.memory_space<vmem>>, %arg6: memref<64x128xbf16, #tpu.memory_space<vmem>>, %arg7: memref<1x128xf32, #tpu.memory_space<vmem>>, %arg8: memref<1024x128xf32, #tpu.memory_space<vmem>>) attributes {dimension_semantics = [#tpu.dimension_semantics<parallel>], iteration_bounds = array<i64: 1>, scalar_prefetch = 0 : i64, scratch_operands = 0 : i64, tpu.core_type = #tpu.core_type<tc>, window_params = [{transform_indices = @transform_0, window_bounds = array<i64: 1024, 32>}, {pipeline_mode = #tpu.pipeline_mode<synchronous>, transform_indices = @transform_1, window_bounds = array<i64: 32, 64>}, {pipeline_mode = #tpu.pipeline_mode<synchronous>, transform_indices = @transform_2, window_bounds = array<i64: 1, 64>}, {pipeline_mode = #tpu.pipeline_mode<synchronous>, transform_indices = @transform_3, window_bounds = array<i64: 64, 64>}, {pipeline_mode = #tpu.pipeline_mode<synchronous>, transform_indices = @transform_4, window_bounds = array<i64: 1, 64>}, {pipeline_mode = #tpu.pipeline_mode<synchronous>, transform_indices = @transform_5, window_bounds = array<i64: 64, 128>}, {pipeline_mode = #tpu.pipeline_mode<synchronous>, transform_indices = @transform_6, window_bounds = array<i64: 1, 128>}, {transform_indices = @transform_7, window_bounds = array<i64: 1024, 128>}]} {
    %c0 = arith.constant 0 : index
    %c0_0 = arith.constant 0 : index
    %0 = vector.load %arg1[%c0, %c0_0] : memref<1024x32xf32, #tpu.memory_space<vmem>>, vector<1024x32xf32>
    %1 = arith.truncf %0 : vector<1024x32xf32> to vector<1024x32xbf16>
    %c0_1 = arith.constant 0 : index
    %c0_2 = arith.constant 0 : index
    %2 = vector.load %arg2[%c0_1, %c0_2] : memref<32x64xbf16, #tpu.memory_space<vmem>>, vector<32x64xbf16>
    %cst = arith.constant dense<0.000000e+00> : vector<1024x64xf32>
    %3 = tpu.matmul %1, %2, %cst {dimension_numbers = #tpu.dot_dimension_numbers<[1], [0], [0], [1], [0, 0, 1, 1], [], []>} : vector<1024x32xbf16>, vector<32x64xbf16>, vector<1024x64xf32> -> vector<1024x64xf32>
    %c0_3 = arith.constant 0 : index
    %c0_4 = arith.constant 0 : index
    %4 = vector.load %arg3[%c0_3, %c0_4] : memref<1x64xf32, #tpu.memory_space<vmem>>, vector<1x64xf32>
    %5 = vector.broadcast %4 : vector<1x64xf32> to vector<1024x64xf32>
    %6 = arith.addf %3, %5 : vector<1024x64xf32>
    %cst_5 = arith.constant 0.000000e+00 : f32
    %7 = vector.broadcast %cst_5 : f32 to vector<1024x64xf32>
    %8 = arith.maximumf %6, %7 : vector<1024x64xf32>
    %9 = arith.truncf %8 : vector<1024x64xf32> to vector<1024x64xbf16>
    %c0_6 = arith.constant 0 : index
    %c0_7 = arith.constant 0 : index
    %10 = vector.load %arg4[%c0_6, %c0_7] : memref<64x64xbf16, #tpu.memory_space<vmem>>, vector<64x64xbf16>
    %cst_8 = arith.constant dense<0.000000e+00> : vector<1024x64xf32>
    %11 = tpu.matmul %9, %10, %cst_8 {dimension_numbers = #tpu.dot_dimension_numbers<[1], [0], [0], [1], [0, 0, 1, 1], [], []>} : vector<1024x64xbf16>, vector<64x64xbf16>, vector<1024x64xf32> -> vector<1024x64xf32>
    %c0_9 = arith.constant 0 : index
    %c0_10 = arith.constant 0 : index
    %12 = vector.load %arg5[%c0_9, %c0_10] : memref<1x64xf32, #tpu.memory_space<vmem>>, vector<1x64xf32>
    %13 = vector.broadcast %12 : vector<1x64xf32> to vector<1024x64xf32>
    %14 = arith.addf %11, %13 : vector<1024x64xf32>
    %cst_11 = arith.constant 0.000000e+00 : f32
    %15 = vector.broadcast %cst_11 : f32 to vector<1024x64xf32>
    %16 = arith.maximumf %14, %15 : vector<1024x64xf32>
    %17 = arith.truncf %16 : vector<1024x64xf32> to vector<1024x64xbf16>
    %c0_12 = arith.constant 0 : index
    %c0_13 = arith.constant 0 : index
    %18 = vector.load %arg6[%c0_12, %c0_13] : memref<64x128xbf16, #tpu.memory_space<vmem>>, vector<64x128xbf16>
    %cst_14 = arith.constant dense<0.000000e+00> : vector<1024x128xf32>
    %19 = tpu.matmul %17, %18, %cst_14 {dimension_numbers = #tpu.dot_dimension_numbers<[1], [0], [0], [1], [0, 0, 1, 1], [], []>} : vector<1024x64xbf16>, vector<64x128xbf16>, vector<1024x128xf32> -> vector<1024x128xf32>
    %c0_15 = arith.constant 0 : index
    %c0_16 = arith.constant 0 : index
    %20 = vector.load %arg7[%c0_15, %c0_16] : memref<1x128xf32, #tpu.memory_space<vmem>>, vector<1x128xf32>
    %21 = vector.broadcast %20 : vector<1x128xf32> to vector<1024x128xf32>
    %22 = arith.addf %19, %21 : vector<1024x128xf32>
    %c0_17 = arith.constant 0 : index
    %c0_18 = arith.constant 0 : index
    %23 = vector.load %arg8[%c0_17, %c0_18] : memref<1024x128xf32, #tpu.memory_space<vmem>>, vector<1024x128xf32>
    tpu.vector_store %arg8[%c0_17, %c0_18], %22 {strides = array<i32>} : memref<1024x128xf32, #tpu.memory_space<vmem>>, vector<1024x128xf32>,
    return
  }
  func.func @transform_0(%arg0: i32) -> (i32, i32) {
    %c0_i32 = arith.constant 0 : i32
    %c0_i32_0 = arith.constant 0 : i32
    return %arg0, %c0_i32 : i32, i32
  }
  func.func @transform_1(%arg0: i32) -> (i32, i32) {
    %c0_i32 = arith.constant 0 : i32
    %c0_i32_0 = arith.constant 0 : i32
    %c0_i32_1 = arith.constant 0 : i32
    return %c0_i32, %c0_i32_0 : i32, i32
  }
  func.func @transform_2(%arg0: i32) -> (i32, i32) {
    %c0_i32 = arith.constant 0 : i32
    %c0_i32_0 = arith.constant 0 : i32
    %c0_i32_1 = arith.constant 0 : i32
    return %c0_i32, %c0_i32_0 : i32, i32
  }
  func.func @transform_3(%arg0: i32) -> (i32, i32) {
    %c0_i32 = arith.constant 0 : i32
    %c0_i32_0 = arith.constant 0 : i32
    %c0_i32_1 = arith.constant 0 : i32
    return %c0_i32, %c0_i32_0 : i32, i32
  }
  func.func @transform_4(%arg0: i32) -> (i32, i32) {
    %c0_i32 = arith.constant 0 : i32
    %c0_i32_0 = arith.constant 0 : i32
    %c0_i32_1 = arith.constant 0 : i32
    return %c0_i32, %c0_i32_0 : i32, i32
  }
  func.func @transform_5(%arg0: i32) -> (i32, i32) {
    %c0_i32 = arith.constant 0 : i32
    %c0_i32_0 = arith.constant 0 : i32
    %c0_i32_1 = arith.constant 0 : i32
    return %c0_i32, %c0_i32_0 : i32, i32
  }
  func.func @transform_6(%arg0: i32) -> (i32, i32) {
    %c0_i32 = arith.constant 0 : i32
    %c0_i32_0 = arith.constant 0 : i32
    %c0_i32_1 = arith.constant 0 : i32
    return %c0_i32, %c0_i32_0 : i32, i32
  }
  func.func @transform_7(%arg0: i32) -> (i32, i32) {
    %c0_i32 = arith.constant 0 : i32
    %c0_i32_0 = arith.constant 0 : i32
    return %arg0, %c0_i32 : i32, i32
  }
}

</mosaic_0001>

<bundles_post_ra>
// kernel: tpu_custom_call.1
= control target key start
LH: loop header
LB: loop body
LE: loop exit
PB: predicated region body
PF: predicated region fallthrough
CT: control target
= control target key end

     0   :  { %vm243_vm0 = vcmask 261120   ;;  %s5066_s0 = inlined_call_operand.vmem [shape: f32[1024,32], index: 0, kind: input, shape index: {}]   ;;  %s5067_s1 = inlined_call_operand.vmem [shape: bf16[32,64], index: 1, kind: input, shape index: {}]   ;;  %s5068_s2 = inlined_call_operand.vmem [shape: f32[1,64], index: 2, kind: input, shape index: {}]   ;;  %s5069_s3 = inlined_call_operand.vmem [shape: bf16[64,64], index: 3, kind: input, shape index: {}]   ;;  %s5070_s4 = inlined_call_operand.vmem [shape: f32[1,64], index: 4, kind: input, shape index: {}]   ;;  %s5071_s5 = inlined_call_operand.vmem [shape: bf16[64,128], index: 5, kind: input, shape index: {}]   ;;  %s5072_s6 = inlined_call_operand.vmem [shape: f32[1,128], index: 6, kind: input, shape index: {}]   ;;  %s5073_s7 = inlined_call_operand.hbm [shape: f32[1024,128], index: 7, kind: output, shape index: {}]  }
   0x1   :  { %v3880_v0 = vld [vmem:[%s5067_s1] sm:$0xff]   ;;  %v3881_v1 = vld [vmem:[%s5067_s1 + $0x8] sm:$0xff]   ;;  %v30_v5 = vld [vmem:[%s5066_s0 + $0x10] sm:$0xff] }
   0x2   :  { %3469 = vmatprep.subr.bf16.mxu0 %v3880_v0  ;;  %v28_v2 = vld [vmem:[%s5066_s0] sm:$0xff]  ;;  %v29_v3 = vld [vmem:[%s5066_s0 + $0x8] sm:$0xff]  ;;  %3873 = vmatprep.subr.bf16.mxu1 %v3880_v0  ;;  %v31_v6 = vld [vmem:[%s5066_s0 + $0x18] sm:$0xff] }
   0x3   :  { %3470 = vmatpush3.bf16.msra.mxu0 %v3880_v0  ;;  %v156_v4 = vpack.c.bf16 %v29_v3, %v28_v2  ;;  %3875 = vmatpush3.bf16.msra.mxu1 %v3880_v0  ;;  %v32_v7 = vld [vmem:[%s5066_s0 + $0x20] sm:$0xff]  ;;  %v33_v8 = vld [vmem:[%s5066_s0 + $0x28] sm:$0xff]  ;;  %v157_v9 = vpack.c.bf16 %v31_v6, %v30_v5  ;;  %v34_v11 = vld [vmem:[%s5066_s0 + $0x30] sm:$0xff] }
   0x4   :  { %3471 = vmatprep.subr.bf16.mxu0 %v3881_v1  ;;  %3874 = vmatprep.subr.bf16.mxu1 %v3881_v1  ;;  %v158_v10 = vpack.c.bf16 %v33_v8, %v32_v7  ;;  %v35_v12 = vld [vmem:[%s5066_s0 + $0x38] sm:$0xff]  ;;  %v36_v13 = vld [vmem:[%s5066_s0 + $0x40] sm:$0xff]  ;;  %v37_v14 = vld [vmem:[%s5066_s0 + $0x48] sm:$0xff] }
   0x5   :  { %3473 = vmatprep.mubr.msk.bf16.mxu0 %vm243_vm0, %v156_v4  ;;  %v159_v15 = vpack.c.bf16 %v35_v12, %v34_v11  ;;  %v160_v16 = vpack.c.bf16 %v37_v14, %v36_v13  ;;  %v38_v17 = vld [vmem:[%s5066_s0 + $0x50] sm:$0xff]  ;;  %v39_v18 = vld [vmem:[%s5066_s0 + $0x58] sm:$0xff]  ;;  %v92_v19 = vld [vmem:[%s5066_s0 + $0x200] sm:$0xff] }
   0x6   :  { %v93_v20 = vld [vmem:[%s5066_s0 + $0x208] sm:$0xff]  ;;  %v94_v21 = vld [vmem:[%s5066_s0 + $0x210] sm:$0xff]  ;;  %v95_v23 = vld [vmem:[%s5066_s0 + $0x218] sm:$0xff]  ;;  %v161_v29 = vpack.c.bf16 %v39_v18, %v38_v17 }
   0x7   :  { %3472 = vmatpush3.bf16.msra.mxu0 %v3881_v1  ;;  %3876 = vmatpush3.bf16.msra.mxu1 %v3881_v1  ;;  %v188_v22 = vpack.c.bf16 %v93_v20, %v92_v19  ;;  %v40_v24 = vld [vmem:[%s5066_s0 + $0x60] sm:$0xff]  ;;  %v41_v25 = vld [vmem:[%s5066_s0 + $0x68] sm:$0xff]  ;;  %v189_v26 = vpack.c.bf16 %v95_v23, %v94_v21  ;;  %v98_v33 = vld [vmem:[%s5066_s0 + $0x230] sm:$0xff] }
   0x8   :  { %v3882_v27 = vld [vmem:[%s5069_s3] sm:$0xff]   ;;  %v97_v30 = vld [vmem:[%s5066_s0 + $0x228] sm:$0xff]  ;;  %v162_v31 = vpack.c.bf16 %v41_v25, %v40_v24  ;;  %v99_v34 = vld [vmem:[%s5066_s0 + $0x238] sm:$0xff] }
   0x9   :  { %3537 = vmatprep.mubr.msk.bf16.mxu1 %vm243_vm0, %v188_v22  ;;  %v96_v28 = vld [vmem:[%s5066_s0 + $0x220] sm:$0xff]  ;;  %3601 = vmatprep.subr.bf16.mxu1 %v3882_v27  ;;  %v101_v36 = vld [vmem:[%s5066_s0 + $0x248] sm:$0xff]  ;;  %v191_v37 = vpack.c.bf16 %v99_v34, %v98_v33  ;;  %v42_v38 = vld [vmem:[%s5066_s0 + $0x70] sm:$0xff] }
   0xa   :  { %3474 = vmatmul.mubr.msk.bf16.vlgmr.msra.gmra.mrb[0].mxu0 %vm243_vm0, %v157_v9  ;;  %3538 = vmatmul.mubr.msk.bf16.vlgmr.msra.gmra.mrb[0].mxu1 %vm243_vm0, %v189_v26  ;;  %v190_v32 = vpack.c.bf16 %v97_v30, %v96_v28  ;;  %v100_v35 = vld [vmem:[%s5066_s0 + $0x240] sm:$0xff]  ;;  %v43_v39 = vld [vmem:[%s5066_s0 + $0x78] sm:$0xff]  ;;  %v45_v42 = vld [vmem:[%s5066_s0 + $0x88] sm:$0xff] }
   0xb   :  { %3477 = vmatprep.mubr.msk.bf16.mxu0 %vm243_vm0, %v158_v10  ;;  %3602 = vmatpush3.bf16.msra.mxu1 %v3882_v27  ;;  %v192_v40 = vpack.c.bf16 %v101_v36, %v100_v35  ;;  %v44_v41 = vld [vmem:[%s5066_s0 + $0x80] sm:$0xff]  ;;  %v163_v43 = vpack.c.bf16 %v43_v39, %v42_v38  ;;  %v102_v44 = vld [vmem:[%s5066_s0 + $0x250] sm:$0xff]  ;;  %v103_v45 = vld [vmem:[%s5066_s0 + $0x258] sm:$0xff] }
   0xc   :  { %3541 = vmatprep.mubr.msk.bf16.mxu1 %vm243_vm0, %v190_v32  ;;  %v164_v46 = vpack.c.bf16 %v45_v42, %v44_v41  ;;  %v3883_v47 = vld [vmem:[%s5069_s3 + $0x8] sm:$0xff]   ;;  %v104_v48 = vld [vmem:[%s5066_s0 + $0x260] sm:$0xff]  ;;  %v193_v50 = vpack.c.bf16 %v103_v45, %v102_v44  ;;  %v46_v51 = vld [vmem:[%s5066_s0 + $0x90] sm:$0xff] }
   0xd   :  { %v105_v49 = vld [vmem:[%s5066_s0 + $0x268] sm:$0xff]  ;;  %3603 = vmatprep.subr.bf16.mxu1 %v3883_v47  ;;  %v47_v52 = vld [vmem:[%s5066_s0 + $0x98] sm:$0xff]  ;;  %v48_v54 = vld [vmem:[%s5066_s0 + $0xa0] sm:$0xff] }
   0xe   :  { %v194_v53 = vpack.c.bf16 %v105_v49, %v104_v48  ;;  %v49_v55 = vld [vmem:[%s5066_s0 + $0xa8] sm:$0xff]  ;;  %v165_v56 = vpack.c.bf16 %v47_v52, %v46_v51  ;;  %v3884_v57 = vld [vmem:[%s5069_s3 + $0x10] sm:$0xff]   ;;  %v107_v60 = vld [vmem:[%s5066_s0 + $0x278] sm:$0xff] }
   0xf   :  { %3604 = vmatpush3.bf16.msra.mxu1 %v3883_v47  ;;  %v166_v58 = vpack.c.bf16 %v49_v55, %v48_v54  ;;  %v106_v59 = vld [vmem:[%s5066_s0 + $0x270] sm:$0xff]  ;;  %v108_v61 = vld [vmem:[%s5066_s0 + $0x280] sm:$0xff]  ;;  %v109_v62 = vld [vmem:[%s5066_s0 + $0x288] sm:$0xff] }
  0x10   :  { %3605 = vmatprep.subr.bf16.mxu1 %v3884_v57  ;;  %v50_v63 = vld [vmem:[%s5066_s0 + $0xb0] sm:$0xff]  ;;  %v195_v0 = vpack.c.bf16 %v107_v60, %v106_v59  ;;  %v51_v1 = vld [vmem:[%s5066_s0 + $0xb8] sm:$0xff]  ;;  %v52_v2 = vld [vmem:[%s5066_s0 + $0xc0] sm:$0xff]  ;;  %v196_v3 = vpack.c.bf16 %v109_v62, %v108_v61 }
  0x11   :  { %v53_v4 = vld [vmem:[%s5066_s0 + $0xc8] sm:$0xff]  ;;  %v3885_v5 = vld [vmem:[%s5069_s3 + $0x18] sm:$0xff]   ;;  %v167_v6 = vpack.c.bf16 %v51_v1, %v50_v63  ;;  %v110_v7 = vld [vmem:[%s5066_s0 + $0x290] sm:$0xff] }
  0x12   :  { %3478 = vmatmul.mubr.msk.bf16.gmra.mrb[4].mxu0 %vm243_vm0, %v159_v15  ;;  %3542 = vmatmul.mubr.msk.bf16.gmra.mrb[4].mxu1 %vm243_vm0, %v191_v37  ;;  %v168_v8 = vpack.c.bf16 %v53_v4, %v52_v2  ;;  %v111_v9 = vld [vmem:[%s5066_s0 + $0x298] sm:$0xff]  ;;  %v112_v10 = vld [vmem:[%s5066_s0 + $0x2a0] sm:$0xff]  ;;  %v113_v11 = vld [vmem:[%s5066_s0 + $0x2a8] sm:$0xff] }
  0x13   :  { %3481 = vmatprep.mubr.msk.bf16.mxu0 %vm243_vm0, %v160_v16  ;;  %3545 = vmatprep.mubr.msk.bf16.mxu1 %vm243_vm0, %v192_v40  ;;  %v197_v12 = vpack.c.bf16 %v111_v9, %v110_v7 }
  0x14   :  { %3606 = vmatpush3.bf16.msra.mxu1 %v3884_v57 }
  0x15   :  { %3607 = vmatprep.subr.bf16.mxu1 %v3885_v5 }
  0x18   :  { %3608 = vmatpush3.bf16.msra.mxu1 %v3885_v5 }
  0x1a   :  { %3482 = vmatmul.mubr.msk.bf16.gmra.mrb[8].mxu0 %vm243_vm0, %v161_v29  ;;  %3546 = vmatmul.mubr.msk.bf16.gmra.mrb[8].mxu1 %vm243_vm0, %v193_v50 }
  0x1b   :  { %3485 = vmatprep.mubr.msk.bf16.mxu0 %vm243_vm0, %v162_v31  ;;  %3549 = vmatprep.mubr.msk.bf16.mxu1 %vm243_vm0, %v194_v53 }
  0x22   :  { %3486 = vmatmul.mubr.msk.bf16.gmra.mrb[12].mxu0 %vm243_vm0, %v163_v43  ;;  %3550 = vmatmul.mubr.msk.bf16.gmra.mrb[12].mxu1 %vm243_vm0, %v195_v0 }
  0x23   :  { %3489 = vmatprep.mubr.msk.bf16.mxu0 %vm243_vm0, %v164_v46  ;;  %3553 = vmatprep.mubr.msk.bf16.mxu1 %vm243_vm0, %v196_v3 }
  0x2a   :  { %3490 = vmatmul.mubr.msk.bf16.gmra.mrb[16].mxu0 %vm243_vm0, %v165_v56 }
  0x2b   :  { %3493 = vmatprep.mubr.msk.bf16.mxu0 %vm243_vm0, %v166_v58 }
  0x32   :  { %3494 = vmatmul.mubr.msk.bf16.gmra.mrb[20].mxu0 %vm243_vm0, %v167_v6 }
  0x33   :  { %12 = vsyncpa [#allocation3], 0  ;;  %3497 = vmatprep.mubr.msk.bf16.mxu0 %vm243_vm0, %v168_v8  ;;  %v54_v13 = vld [vmem:[%s5066_s0 + $0xd0] sm:$0xff]  ;;  %v55_v14 = vld [vmem:[%s5066_s0 + $0xd8] sm:$0xff]  ;;  %v198_v15 = vpack.c.bf16 %v113_v11, %v112_v10  ;;  %3554 = vmatmul.mubr.msk.bf16.gmra.mrb[16].mxu1 %vm243_vm0, %v197_v12  ;;  %vm1212_vm1 = vcmask 523264  }
  0x34   :  { %v56_v16 = vld [vmem:[%s5066_s0 + $0xe0] sm:$0xff]  ;;  %v57_v17 = vld [vmem:[%s5066_s0 + $0xe8] sm:$0xff]  ;;  %v169_v18 = vpack.c.bf16 %v55_v14, %v54_v13  ;;  %v114_v20 = vld [vmem:[%s5066_s0 + $0x2b0] sm:$0xff] }
  0x35   :  { %v170_v19 = vpack.c.bf16 %v57_v17, %v56_v16  ;;  %3557 = vmatprep.mubr.msk.bf16.mxu1 %vm243_vm0, %v198_v15  ;;  %v115_v21 = vld [vmem:[%s5066_s0 + $0x2b8] sm:$0xff]  ;;  %v116_v22 = vld [vmem:[%s5066_s0 + $0x2c0] sm:$0xff]  ;;  %v117_v23 = vld [vmem:[%s5066_s0 + $0x2c8] sm:$0xff] }
  0x36   :  { %v199_v24 = vpack.c.bf16 %v115_v21, %v114_v20  ;;  %v58_v25 = vld [vmem:[%s5066_s0 + $0xf0] sm:$0xff]  ;;  %v59_v26 = vld [vmem:[%s5066_s0 + $0xf8] sm:$0xff]  ;;  %v200_v27 = vpack.c.bf16 %v117_v23, %v116_v22  ;;  %v60_v28 = vld [vmem:[%s5066_s0 + $0x100] sm:$0xff] }
  0x37   :  { %v61_v29 = vld [vmem:[%s5066_s0 + $0x108] sm:$0xff]  ;;  %v171_v30 = vpack.c.bf16 %v59_v26, %v58_v25  ;;  %v118_v32 = vld [vmem:[%s5066_s0 + $0x2d0] sm:$0xff]  ;;  %v119_v33 = vld [vmem:[%s5066_s0 + $0x2d8] sm:$0xff] }
  0x38   :  { %v172_v31 = vpack.c.bf16 %v61_v29, %v60_v28  ;;  %v120_v34 = vld [vmem:[%s5066_s0 + $0x2e0] sm:$0xff]  ;;  %v121_v35 = vld [vmem:[%s5066_s0 + $0x2e8] sm:$0xff]  ;;  %v201_v36 = vpack.c.bf16 %v119_v33, %v118_v32  ;;  %v62_v37 = vld [vmem:[%s5066_s0 + $0x110] sm:$0xff] }
  0x39   :  { %v63_v38 = vld [vmem:[%s5066_s0 + $0x118] sm:$0xff]  ;;  %v202_v39 = vpack.c.bf16 %v121_v35, %v120_v34  ;;  %v64_v40 = vld [vmem:[%s5066_s0 + $0x120] sm:$0xff]  ;;  %v65_v41 = vld [vmem:[%s5066_s0 + $0x128] sm:$0xff] }
  0x3a   :  { %3498 = vmatmul.mubr.msk.bf16.gmra.mrb[24].mxu0 %vm243_vm0, %v169_v18  ;;  %v173_v42 = vpack.c.bf16 %v63_v38, %v62_v37  ;;  %v174_v43 = vpack.c.bf16 %v65_v41, %v64_v40  ;;  %v122_v44 = vld [vmem:[%s5066_s0 + $0x2f0] sm:$0xff]  ;;  %v123_v45 = vld [vmem:[%s5066_s0 + $0x2f8] sm:$0xff]  ;;  %v124_v46 = vld [vmem:[%s5066_s0 + $0x300] sm:$0xff] }
  0x3b   :  { %3501 = vmatprep.mubr.msk.bf16.mxu0 %vm243_vm0, %v170_v19  ;;  %3558 = vmatmul.mubr.msk.bf16.gmra.mrb[20].mxu1 %vm243_vm0, %v199_v24  ;;  %v125_v47 = vld [vmem:[%s5066_s0 + $0x308] sm:$0xff]  ;;  %v203_v48 = vpack.c.bf16 %v123_v45, %v122_v44  ;;  %v66_v49 = vld [vmem:[%s5066_s0 + $0x130] sm:$0xff]  ;;  %v67_v50 = vld [vmem:[%s5066_s0 + $0x138] sm:$0xff] }
  0x3c   :  { %3561 = vmatprep.mubr.msk.bf16.mxu1 %vm243_vm0, %v200_v27  ;;  %v204_v51 = vpack.c.bf16 %v125_v47, %v124_v46  ;;  %v68_v52 = vld [vmem:[%s5066_s0 + $0x140] sm:$0xff]  ;;  %v69_v53 = vld [vmem:[%s5066_s0 + $0x148] sm:$0xff]  ;;  %v175_v54 = vpack.c.bf16 %v67_v50, %v66_v49  ;;  %v126_v56 = vld [vmem:[%s5066_s0 + $0x310] sm:$0xff] }
  0x3d   :  { %v176_v55 = vpack.c.bf16 %v69_v53, %v68_v52  ;;  %v127_v57 = vld [vmem:[%s5066_s0 + $0x318] sm:$0xff]  ;;  %v128_v58 = vld [vmem:[%s5066_s0 + $0x320] sm:$0xff]  ;;  %v129_v59 = vld [vmem:[%s5066_s0 + $0x328] sm:$0xff] }
  0x3e   :  { %v205_v60 = vpack.c.bf16 %v127_v57, %v126_v56  ;;  %v70_v61 = vld [vmem:[%s5066_s0 + $0x150] sm:$0xff]  ;;  %v71_v62 = vld [vmem:[%s5066_s0 + $0x158] sm:$0xff]  ;;  %v206_v63 = vpack.c.bf16 %v129_v59, %v128_v58  ;;  %v72_v0 = vld [vmem:[%s5066_s0 + $0x160] sm:$0xff] }
  0x3f   :  { %v73_v1 = vld [vmem:[%s5066_s0 + $0x168] sm:$0xff]  ;;  %v177_v2 = vpack.c.bf16 %v71_v62, %v70_v61  ;;  %v130_v4 = vld [vmem:[%s5066_s0 + $0x330] sm:$0xff]  ;;  %v131_v5 = vld [vmem:[%s5066_s0 + $0x338] sm:$0xff] }
  0x40   :  { %v178_v3 = vpack.c.bf16 %v73_v1, %v72_v0  ;;  %v132_v6 = vld [vmem:[%s5066_s0 + $0x340] sm:$0xff]  ;;  %v133_v7 = vld [vmem:[%s5066_s0 + $0x348] sm:$0xff]  ;;  %v207_v8 = vpack.c.bf16 %v131_v5, %v130_v4  ;;  %v74_v9 = vld [vmem:[%s5066_s0 + $0x170] sm:$0xff] }
  0x41   :  { %v75_v10 = vld [vmem:[%s5066_s0 + $0x178] sm:$0xff]  ;;  %v208_v11 = vpack.c.bf16 %v133_v7, %v132_v6  ;;  %v76_v12 = vld [vmem:[%s5066_s0 + $0x180] sm:$0xff]  ;;  %v77_v13 = vld [vmem:[%s5066_s0 + $0x188] sm:$0xff] }
  0x42   :  { %3502 = vmatmul.mubr.msk.bf16.gmra.mrb[28].mxu0 %vm243_vm0, %v171_v30  ;;  %v179_v14 = vpack.c.bf16 %v75_v10, %v74_v9  ;;  %v180_v15 = vpack.c.bf16 %v77_v13, %v76_v12  ;;  %v134_v16 = vld [vmem:[%s5066_s0 + $0x350] sm:$0xff]  ;;  %v135_v17 = vld [vmem:[%s5066_s0 + $0x358] sm:$0xff]  ;;  %v136_v18 = vld [vmem:[%s5066_s0 + $0x360] sm:$0xff] }
  0x43   :  { %3505 = vmatprep.mubr.msk.bf16.mxu0 %vm243_vm0, %v172_v31  ;;  %3562 = vmatmul.mubr.msk.bf16.gmra.mrb[24].mxu1 %vm243_vm0, %v201_v36  ;;  %v137_v19 = vld [vmem:[%s5066_s0 + $0x368] sm:$0xff]  ;;  %v209_v20 = vpack.c.bf16 %v135_v17, %v134_v16  ;;  %v78_v21 = vld [vmem:[%s5066_s0 + $0x190] sm:$0xff]  ;;  %v79_v22 = vld [vmem:[%s5066_s0 + $0x198] sm:$0xff] }
  0x44   :  { %3565 = vmatprep.mubr.msk.bf16.mxu1 %vm243_vm0, %v202_v39  ;;  %v210_v23 = vpack.c.bf16 %v137_v19, %v136_v18  ;;  %v80_v24 = vld [vmem:[%s5066_s0 + $0x1a0] sm:$0xff]  ;;  %v81_v25 = vld [vmem:[%s5066_s0 + $0x1a8] sm:$0xff]  ;;  %v181_v26 = vpack.c.bf16 %v79_v22, %v78_v21  ;;  %v138_v28 = vld [vmem:[%s5066_s0 + $0x370] sm:$0xff] }
  0x45   :  { %v182_v27 = vpack.c.bf16 %v81_v25, %v80_v24  ;;  %v139_v29 = vld [vmem:[%s5066_s0 + $0x378] sm:$0xff]  ;;  %v140_v30 = vld [vmem:[%s5066_s0 + $0x380] sm:$0xff]  ;;  %v141_v31 = vld [vmem:[%s5066_s0 + $0x388] sm:$0xff] }
  0x46   :  { %v211_v32 = vpack.c.bf16 %v139_v29, %v138_v28  ;;  %v82_v33 = vld [vmem:[%s5066_s0 + $0x1b0] sm:$0xff]  ;;  %v83_v34 = vld [vmem:[%s5066_s0 + $0x1b8] sm:$0xff]  ;;  %v212_v35 = vpack.c.bf16 %v141_v31, %v140_v30  ;;  %v84_v36 = vld [vmem:[%s5066_s0 + $0x1c0] sm:$0xff] }
  0x47   :  { %v85_v37 = vld [vmem:[%s5066_s0 + $0x1c8] sm:$0xff]  ;;  %v183_v38 = vpack.c.bf16 %v83_v34, %v82_v33  ;;  %v142_v40 = vld [vmem:[%s5066_s0 + $0x390] sm:$0xff]  ;;  %v143_v41 = vld [vmem:[%s5066_s0 + $0x398] sm:$0xff] }
  0x48   :  { %v184_v39 = vpack.c.bf16 %v85_v37, %v84_v36  ;;  %v213_v44 = vpack.c.bf16 %v143_v41, %v142_v40  ;;  %v86_v45 = vld [vmem:[%s5066_s0 + $0x1d0] sm:$0xff]  ;;  %v87_v46 = vld [vmem:[%s5066_s0 + $0x1d8] sm:$0xff]  ;;  %v89_v49 = vld [vmem:[%s5066_s0 + $0x1e8] sm:$0xff] }
  0x49   :  { %v185_v50 = vpack.c.bf16 %v87_v46, %v86_v45  ;;  %v146_v52 = vld [vmem:[%s5066_s0 + $0x3b0] sm:$0xff]  ;;  %v147_v53 = vld [vmem:[%s5066_s0 + $0x3b8] sm:$0xff]  ;;  %v153_v0 = vld [vmem:[%s5066_s0 + $0x3e8] sm:$0xff] }
  0x4a   :  { %3506 = vmatmul.mubr.msk.bf16.gmra.mrb[32].mxu0 %vm243_vm0, %v173_v42  ;;  %v144_v42 = vld [vmem:[%s5066_s0 + $0x3a0] sm:$0xff]  ;;  %v215_v56 = vpack.c.bf16 %v147_v53, %v146_v52  ;;  %v90_v57 = vld [vmem:[%s5066_s0 + $0x1f0] sm:$0xff]  ;;  %v91_v58 = vld [vmem:[%s5066_s0 + $0x1f8] sm:$0xff] }
  0x4b   :  { %3509 = vmatprep.mubr.msk.bf16.mxu0 %vm243_vm0, %v174_v43  ;;  %3566 = vmatmul.mubr.msk.bf16.gmra.mrb[28].mxu1 %vm243_vm0, %v203_v48  ;;  %v145_v43 = vld [vmem:[%s5066_s0 + $0x3a8] sm:$0xff]  ;;  %v88_v48 = vld [vmem:[%s5066_s0 + $0x1e0] sm:$0xff]  ;;  %v150_v61 = vld [vmem:[%s5066_s0 + $0x3d0] sm:$0xff] }
  0x4c   :  { %3569 = vmatprep.mubr.msk.bf16.mxu1 %vm243_vm0, %v204_v51  ;;  %v214_v47 = vpack.c.bf16 %v145_v43, %v144_v42  ;;  %v186_v51 = vpack.c.bf16 %v89_v49, %v88_v48  ;;  %v151_v62 = vld [vmem:[%s5066_s0 + $0x3d8] sm:$0xff]  ;;  %v3886_v6 = vld [vmem:[%s5071_s5] sm:$0xff]   ;;  %v3887_v16 = vld [vmem:[%s5071_s5 + $0x8] sm:$0xff]  }
  0x4d   :  { %v217_v1 = vpack.c.bf16 %v151_v62, %v150_v61  ;;  %v155_v4 = vld [vmem:[%s5066_s0 + $0x3f8] sm:$0xff]  ;;  %3737 = vmatprep.subr.bf16.mxu0 %v3886_v6  ;;  %v4430_v7 = vld [vmem:[%s5068_s2] ss:$0 sm:$0xff] }
  0x4e   :  { %3738 = vmatpush3.bf16.msra.mxu0 %v3886_v6 }
  0x4f   :  { %3739 = vmatprep.subr.bf16.mxu0 %v3887_v16 }
  0x52   :  { %3510 = vmatmul.mubr.msk.bf16.gmra.mrb[36].mxu0 %vm243_vm0, %v175_v54  ;;  %v148_v54 = vld [vmem:[%s5066_s0 + $0x3c0] sm:$0xff] }
  0x53   :  { %3513 = vmatprep.mubr.msk.bf16.mxu0 %vm243_vm0, %v176_v55  ;;  %3570 = vmatmul.mubr.msk.bf16.gmra.mrb[32].mxu1 %vm243_vm0, %v205_v60  ;;  %v149_v55 = vld [vmem:[%s5066_s0 + $0x3c8] sm:$0xff]  ;;  %v187_v60 = vpack.c.bf16 %v91_v58, %v90_v57 }
  0x54   :  { %3573 = vmatprep.mubr.msk.bf16.mxu1 %vm243_vm0, %v206_v63  ;;  %v216_v59 = vpack.c.bf16 %v149_v55, %v148_v54  ;;  %v152_v63 = vld [vmem:[%s5066_s0 + $0x3e0] sm:$0xff]  ;;  %3740 = vmatpush3.bf16.msra.mxu0 %v3887_v16 }
  0x5a   :  { %3514 = vmatmul.mubr.msk.bf16.gmra.mrb[40].mxu0 %vm243_vm0, %v177_v2  ;;  %v218_v2 = vpack.c.bf16 %v153_v0, %v152_v63 }
  0x5b   :  { %3517 = vmatprep.mubr.msk.bf16.mxu0 %vm243_vm0, %v178_v3  ;;  %3574 = vmatmul.mubr.msk.bf16.gmra.mrb[36].mxu1 %vm243_vm0, %v207_v8  ;;  %v154_v3 = vld [vmem:[%s5066_s0 + $0x3f0] sm:$0xff] }
  0x5c   :  { %3577 = vmatprep.mubr.msk.bf16.mxu1 %vm243_vm0, %v208_v11  ;;  %v219_v5 = vpack.c.bf16 %v155_v4, %v154_v3 }
  0x62   :  { %3518 = vmatmul.mubr.msk.bf16.gmra.mrb[44].mxu0 %vm243_vm0, %v179_v14 }
  0x63   :  { %3521 = vmatprep.mubr.msk.bf16.mxu0 %vm243_vm0, %v180_v15  ;;  %3578 = vmatmul.mubr.msk.bf16.gmra.mrb[40].mxu1 %vm243_vm0, %v209_v20 }
  0x64   :  { %3581 = vmatprep.mubr.msk.bf16.mxu1 %vm243_vm0, %v210_v23 }
  0x6a   :  { %3522 = vmatmul.mubr.msk.bf16.gmra.mrb[48].mxu0 %vm243_vm0, %v181_v26 }
  0x6b   :  { %3525 = vmatprep.mubr.msk.bf16.mxu0 %vm243_vm0, %v182_v27  ;;  %3582 = vmatmul.mubr.msk.bf16.gmra.mrb[44].mxu1 %vm243_vm0, %v211_v32 }
  0x6c   :  { %3585 = vmatprep.mubr.msk.bf16.mxu1 %vm243_vm0, %v212_v35 }
  0x72   :  { %3526 = vmatmul.mubr.msk.bf16.gmra.mrb[52].mxu0 %vm243_vm0, %v183_v38 }
  0x73   :  { %3529 = vmatprep.mubr.msk.bf16.mxu0 %vm243_vm0, %v184_v39  ;;  %3586 = vmatmul.mubr.msk.bf16.gmra.mrb[48].mxu1 %vm243_vm0, %v213_v44 }
  0x74   :  { %3589 = vmatprep.mubr.msk.bf16.mxu1 %vm243_vm0, %v214_v47 }
  0x7a   :  { %3530 = vmatmul.mubr.msk.bf16.gmra.mrb[56].mxu0 %vm243_vm0, %v185_v50 }
  0x7b   :  { %3533 = vmatprep.mubr.msk.bf16.mxu0 %vm243_vm0, %v186_v51  ;;  %3590 = vmatmul.mubr.msk.bf16.gmra.mrb[52].mxu1 %vm243_vm0, %v215_v56 }
  0x7c   :  { %3593 = vmatprep.mubr.msk.bf16.mxu1 %vm243_vm0, %v216_v59 }
  0x82   :  { %3534 = vmatmul.mubr.msk.bf16.gmra.mrb[60].mxu0 %vm243_vm0, %v187_v60 }
  0x83   :  { %3594 = vmatmul.mubr.msk.bf16.gmra.mrb[56].mxu1 %vm243_vm0, %v217_v1 }
  0x84   :  { %3597 = vmatprep.mubr.msk.bf16.mxu1 %vm243_vm0, %v218_v2 }
  0x8b   :  { %3598 = vmatmul.mubr.msk.bf16.gmra.mrb[60].mxu1 %vm243_vm0, %v219_v5 }
  0xdd   :  { %v3475_v8 = vpop.f32.mrb[0].mxu0  ;;  %v3539_v31 = vpop.f32.mrb[0].mxu1 }
  0xde   :  { %v479_v9 = vadd.f32 %v3475_v8, %v4430_v7  ;;  %v470_v10 = vpop.f32.mrb[1].mxu0  ;;  %v735_v34 = vadd.f32 %v3539_v31, %v4430_v7  ;;  %v726_v35 = vpop.f32.mrb[1].mxu1 }
  0xdf   :  { %v471_v11 = vadd.f32 %v4430_v7, %v470_v10  ;;  %v3476_v12 = vpop.f32.mrb[2].mxu0  ;;  %v727_v38 = vadd.f32 %v4430_v7, %v726_v35  ;;  %v3540_v39 = vpop.f32.mrb[2].mxu1 }
  0xe0   :  { %v482_v13 = vadd.f32 %v3476_v12, %v4430_v7  ;;  %v473_v14 = vpop.f32.mrb[3].mxu0  ;;  %v983_v17 = vmax.f32 %v479_v9, 0.0  ;;  %v1047_v41 = vmax.f32 %v735_v34, 0.0  ;;  %v738_v42 = vadd.f32 %v3540_v39, %v4430_v7  ;;  %v729_v43 = vpop.f32.mrb[3].mxu1 }
  0xe1   :  { %v474_v15 = vadd.f32 %v4430_v7, %v473_v14  ;;  %v981_v19 = vmax.f32 %v471_v11, 0.0  ;;  %v1045_v46 = vmax.f32 %v727_v38, 0.0  ;;  %v730_v47 = vadd.f32 %v4430_v7, %v729_v43 }
  0xe2   :  { %v984_v18 = vmax.f32 %v482_v13, 0.0  ;;  %v1048_v50 = vmax.f32 %v738_v42, 0.0 }
  0xe3   :  { %v982_v20 = vmax.f32 %v474_v15, 0.0  ;;  %v1046_v53 = vmax.f32 %v730_v47, 0.0 }
  0xe4   :  { %v1110_v21 = vpack.c.bf16 %v984_v18, %v983_v17  ;;  %v4454_v56 = vpack.c.bf16 %v1048_v50, %v1047_v41 }
  0xe5   :  { %v1109_v22 = vpack.c.bf16 %v982_v20, %v981_v19  ;;  %v3479_v23 = vpop.f32.mrb[4].mxu0  ;;  %v4457_v58 = vpack.c.bf16 %v1046_v53, %v1045_v46  ;;  %v3543_v59 = vpop.f32.mrb[4].mxu1  ;;  %v3888_v53 = vld [vmem:[%s5071_s5 + $0x10] sm:$0xff]  }
  0xe6   :  { %v495_v24 = vadd.f32 %v3479_v23, %v4430_v7  ;;  %v486_v25 = vpop.f32.mrb[5].mxu0  ;;  %v751_v62 = vadd.f32 %v3543_v59, %v4430_v7  ;;  %v742_v63 = vpop.f32.mrb[5].mxu1  ;;  %3741 = vmatprep.subr.bf16.mxu0 %v3888_v53 }
  0xe7   :  { %v487_v26 = vadd.f32 %v4430_v7, %v486_v25  ;;  %v3480_v27 = vpop.f32.mrb[6].mxu0  ;;  %3609 = vmatprep.mubr.msk.bf16.mxu1 %vm1212_vm1, %v1109_v22  ;;  %v743_v2 = vadd.f32 %v4430_v7, %v742_v63  ;;  %v3544_v3 = vpop.f32.mrb[6].mxu1  ;;  %3742 = vmatpush3.bf16.msra.mxu0 %v3888_v53 }
  0xe8   :  { %v498_v28 = vadd.f32 %v3480_v27, %v4430_v7  ;;  %v489_v29 = vpop.f32.mrb[7].mxu0  ;;  %3610 = vmatmul.mubr.msk.bf16.vlgmr.msra.gmra.mrb[64].mxu1 %vm1212_vm1, %v1110_v21  ;;  %v987_v32 = vmax.f32 %v495_v24, 0.0  ;;  %v1051_v5 = vmax.f32 %v751_v62, 0.0  ;;  %v754_v6 = vadd.f32 %v3544_v3, %v4430_v7  ;;  %v745_v8 = vpop.f32.mrb[7].mxu1 }
  0xe9   :  { %v490_v30 = vadd.f32 %v4430_v7, %v489_v29  ;;  %v985_v36 = vmax.f32 %v487_v26, 0.0  ;;  %v1049_v11 = vmax.f32 %v743_v2, 0.0  ;;  %v746_v12 = vadd.f32 %v4430_v7, %v745_v8 }
  0xea   :  { %v988_v33 = vmax.f32 %v498_v28, 0.0  ;;  %v1052_v15 = vmax.f32 %v754_v6, 0.0 }
  0xeb   :  { %v986_v37 = vmax.f32 %v490_v30, 0.0  ;;  %v1050_v18 = vmax.f32 %v746_v12, 0.0 }
  0xec   :  { %v1112_v40 = vpack.c.bf16 %v988_v33, %v987_v32  ;;  %v4468_v21 = vpack.c.bf16 %v1052_v15, %v1051_v5 }
  0xed   :  { %v1111_v44 = vpack.c.bf16 %v986_v37, %v985_v36  ;;  %v3483_v45 = vpop.f32.mrb[8].mxu0  ;;  %v4471_v23 = vpack.c.bf16 %v1050_v18, %v1049_v11  ;;  %v3547_v24 = vpop.f32.mrb[8].mxu1 }
  0xee   :  { %v511_v48 = vadd.f32 %v3483_v45, %v4430_v7  ;;  %v502_v49 = vpop.f32.mrb[9].mxu0  ;;  %v767_v27 = vadd.f32 %v3547_v24, %v4430_v7  ;;  %v758_v28 = vpop.f32.mrb[9].mxu1 }
  0xef   :  { %v503_v51 = vadd.f32 %v4430_v7, %v502_v49  ;;  %v3484_v52 = vpop.f32.mrb[10].mxu0  ;;  %3613 = vmatprep.mubr.msk.bf16.mxu1 %vm1212_vm1, %v1111_v44  ;;  %v759_v31 = vadd.f32 %v4430_v7, %v758_v28  ;;  %v3548_v32 = vpop.f32.mrb[10].mxu1 }
  0xf0   :  { %v514_v54 = vadd.f32 %v3484_v52, %v4430_v7  ;;  %v505_v55 = vpop.f32.mrb[11].mxu0  ;;  %3614 = vmatmul.mubr.msk.bf16.gmra.mrb[68].mxu1 %vm1212_vm1, %v1112_v40  ;;  %v991_v60 = vmax.f32 %v511_v48, 0.0  ;;  %v1055_v34 = vmax.f32 %v767_v27, 0.0  ;;  %v770_v35 = vadd.f32 %v3548_v32, %v4430_v7  ;;  %v761_v36 = vpop.f32.mrb[11].mxu1 }
  0xf1   :  { %v506_v57 = vadd.f32 %v4430_v7, %v505_v55  ;;  %v989_v0 = vmax.f32 %v503_v51, 0.0  ;;  %v1053_v39 = vmax.f32 %v759_v31, 0.0  ;;  %v762_v40 = vadd.f32 %v4430_v7, %v761_v36 }
  0xf2   :  { %v992_v61 = vmax.f32 %v514_v54, 0.0  ;;  %v1056_v43 = vmax.f32 %v770_v35, 0.0 }
  0xf3   :  { %v990_v1 = vmax.f32 %v506_v57, 0.0  ;;  %v1054_v46 = vmax.f32 %v762_v40, 0.0 }
  0xf4   :  { %v1114_v4 = vpack.c.bf16 %v992_v61, %v991_v60  ;;  %v4482_v49 = vpack.c.bf16 %v1056_v43, %v1055_v34 }
  0xf5   :  { %v1113_v9 = vpack.c.bf16 %v990_v1, %v989_v0  ;;  %v3487_v10 = vpop.f32.mrb[12].mxu0  ;;  %v4485_v51 = vpack.c.bf16 %v1054_v46, %v1053_v39  ;;  %v3551_v52 = vpop.f32.mrb[12].mxu1 }
  0xf6   :  { %v527_v13 = vadd.f32 %v3487_v10, %v4430_v7  ;;  %v518_v14 = vpop.f32.mrb[13].mxu0  ;;  %v783_v57 = vadd.f32 %v3551_v52, %v4430_v7  ;;  %v774_v59 = vpop.f32.mrb[13].mxu1 }
  0xf7   :  { %v519_v16 = vadd.f32 %v4430_v7, %v518_v14  ;;  %v3488_v17 = vpop.f32.mrb[14].mxu0  ;;  %3617 = vmatprep.mubr.msk.bf16.mxu1 %vm1212_vm1, %v1113_v9  ;;  %v775_v62 = vadd.f32 %v4430_v7, %v774_v59  ;;  %v3552_v63 = vpop.f32.mrb[14].mxu1 }
  0xf8   :  { %v530_v19 = vadd.f32 %v3488_v17, %v4430_v7  ;;  %v521_v20 = vpop.f32.mrb[15].mxu0  ;;  %3618 = vmatmul.mubr.msk.bf16.gmra.mrb[72].mxu1 %vm1212_vm1, %v1114_v4  ;;  %v995_v25 = vmax.f32 %v527_v13, 0.0  ;;  %v1059_v1 = vmax.f32 %v783_v57, 0.0  ;;  %v786_v2 = vadd.f32 %v3552_v63, %v4430_v7  ;;  %v777_v3 = vpop.f32.mrb[15].mxu1 }
  0xf9   :  { %v522_v22 = vadd.f32 %v4430_v7, %v521_v20  ;;  %v993_v29 = vmax.f32 %v519_v16, 0.0  ;;  %v1057_v6 = vmax.f32 %v775_v62, 0.0  ;;  %v778_v8 = vadd.f32 %v4430_v7, %v777_v3 }
  0xfa   :  { %v996_v26 = vmax.f32 %v530_v19, 0.0  ;;  %v1060_v11 = vmax.f32 %v786_v2, 0.0 }
  0xfb   :  { %v994_v30 = vmax.f32 %v522_v22, 0.0  ;;  %v1058_v14 = vmax.f32 %v778_v8, 0.0 }
  0xfc   :  { %v1116_v33 = vpack.c.bf16 %v996_v26, %v995_v25  ;;  %v4499_v17 = vpack.c.bf16 %v1060_v11, %v1059_v1 }
  0xfd   :  { %v1115_v37 = vpack.c.bf16 %v994_v30, %v993_v29  ;;  %v3491_v38 = vpop.f32.mrb[16].mxu0  ;;  %v4502_v19 = vpack.c.bf16 %v1058_v14, %v1057_v6 }
  0xfe   :  { %v543_v41 = vadd.f32 %v3491_v38, %v4430_v7  ;;  %v534_v42 = vpop.f32.mrb[17].mxu0 }
  0xff   :  { %v535_v44 = vadd.f32 %v4430_v7, %v534_v42  ;;  %v3492_v45 = vpop.f32.mrb[18].mxu0  ;;  %3621 = vmatprep.mubr.msk.bf16.mxu1 %vm1212_vm1, %v1115_v37 }
 0x100   :  { %v546_v47 = vadd.f32 %v3492_v45, %v4430_v7  ;;  %v537_v48 = vpop.f32.mrb[19].mxu0  ;;  %3622 = vmatmul.mubr.msk.bf16.gmra.mrb[76].mxu1 %vm1212_vm1, %v1116_v33  ;;  %v999_v54 = vmax.f32 %v543_v41, 0.0 }
 0x101   :  { %v538_v50 = vadd.f32 %v4430_v7, %v537_v48  ;;  %v997_v60 = vmax.f32 %v535_v44, 0.0 }
 0x102   :  { %v1000_v55 = vmax.f32 %v546_v47, 0.0 }
 0x103   :  { %v998_v61 = vmax.f32 %v538_v50, 0.0 }
 0x104   :  { %v1118_v0 = vpack.c.bf16 %v1000_v55, %v999_v54 }
 0x105   :  { %v1117_v4 = vpack.c.bf16 %v998_v61, %v997_v60  ;;  %v3495_v5 = vpop.f32.mrb[20].mxu0 }
 0x106   :  { %v559_v9 = vadd.f32 %v3495_v5, %v4430_v7  ;;  %v550_v10 = vpop.f32.mrb[21].mxu0  ;;  %v3555_v20 = vpop.f32.mrb[16].mxu1 }
 0x107   :  { %v551_v12 = vadd.f32 %v4430_v7, %v550_v10  ;;  %v3496_v13 = vpop.f32.mrb[22].mxu0  ;;  %3625 = vmatprep.mubr.msk.bf16.mxu1 %vm1212_vm1, %v1117_v4  ;;  %v799_v25 = vadd.f32 %v3555_v20, %v4430_v7  ;;  %v790_v26 = vpop.f32.mrb[17].mxu1 }
 0x108   :  { %v562_v15 = vadd.f32 %v3496_v13, %v4430_v7  ;;  %v553_v16 = vpop.f32.mrb[23].mxu0  ;;  %3626 = vmatmul.mubr.msk.bf16.gmra.mrb[80].mxu1 %vm1212_vm1, %v1118_v0  ;;  %v1003_v22 = vmax.f32 %v559_v9, 0.0  ;;  %v791_v29 = vadd.f32 %v4430_v7, %v790_v26  ;;  %v3556_v30 = vpop.f32.mrb[18].mxu1 }
 0x109   :  { %v554_v18 = vadd.f32 %v4430_v7, %v553_v16  ;;  %v1001_v27 = vmax.f32 %v551_v12, 0.0  ;;  %v1063_v32 = vmax.f32 %v799_v25, 0.0  ;;  %v802_v33 = vadd.f32 %v3556_v30, %v4430_v7  ;;  %v793_v34 = vpop.f32.mrb[19].mxu1 }
 0x10a   :  { %v1004_v24 = vmax.f32 %v562_v15, 0.0  ;;  %v1061_v37 = vmax.f32 %v791_v29, 0.0  ;;  %v794_v38 = vadd.f32 %v4430_v7, %v793_v34 }
 0x10b   :  { %v1002_v28 = vmax.f32 %v554_v18, 0.0  ;;  %v1064_v41 = vmax.f32 %v802_v33, 0.0 }
 0x10c   :  { %v1120_v31 = vpack.c.bf16 %v1004_v24, %v1003_v22  ;;  %v1062_v44 = vmax.f32 %v794_v38, 0.0 }
 0x10d   :  { %v1119_v35 = vpack.c.bf16 %v1002_v28, %v1001_v27  ;;  %v3499_v36 = vpop.f32.mrb[24].mxu0  ;;  %v4513_v47 = vpack.c.bf16 %v1064_v41, %v1063_v32 }
 0x10e   :  { %v575_v39 = vadd.f32 %v3499_v36, %v4430_v7  ;;  %v566_v40 = vpop.f32.mrb[25].mxu0  ;;  %v4516_v50 = vpack.c.bf16 %v1062_v44, %v1061_v37  ;;  %v3559_v52 = vpop.f32.mrb[20].mxu1 }
 0x10f   :  { %v567_v42 = vadd.f32 %v4430_v7, %v566_v40  ;;  %v3500_v43 = vpop.f32.mrb[26].mxu0  ;;  %3629 = vmatprep.mubr.msk.bf16.mxu1 %vm1212_vm1, %v1119_v35  ;;  %v815_v55 = vadd.f32 %v3559_v52, %v4430_v7  ;;  %v806_v57 = vpop.f32.mrb[21].mxu1 }
 0x110   :  { %v578_v45 = vadd.f32 %v3500_v43, %v4430_v7  ;;  %v569_v46 = vpop.f32.mrb[27].mxu0  ;;  %3630 = vmatmul.mubr.msk.bf16.gmra.mrb[84].mxu1 %vm1212_vm1, %v1120_v31  ;;  %v1007_v53 = vmax.f32 %v575_v39, 0.0  ;;  %v807_v61 = vadd.f32 %v4430_v7, %v806_v57  ;;  %v3560_v62 = vpop.f32.mrb[22].mxu1  ;;  %v3889_v57 = vld [vmem:[%s5071_s5 + $0x18] sm:$0xff]  }
 0x111   :  { %v570_v48 = vadd.f32 %v4430_v7, %v569_v46  ;;  %v1005_v59 = vmax.f32 %v567_v42, 0.0  ;;  %v1067_v0 = vmax.f32 %v815_v55, 0.0  ;;  %v818_v1 = vadd.f32 %v3560_v62, %v4430_v7  ;;  %v809_v2 = vpop.f32.mrb[23].mxu1  ;;  %3743 = vmatprep.subr.bf16.mxu0 %v3889_v57 }
 0x112   :  { %v1008_v54 = vmax.f32 %v578_v45, 0.0  ;;  %v1065_v5 = vmax.f32 %v807_v61, 0.0  ;;  %v810_v6 = vadd.f32 %v4430_v7, %v809_v2  ;;  %3744 = vmatpush3.bf16.msra.mxu0 %v3889_v57 }
 0x113   :  { %v1006_v60 = vmax.f32 %v570_v48, 0.0  ;;  %v1068_v10 = vmax.f32 %v818_v1, 0.0 }
 0x114   :  { %v1122_v63 = vpack.c.bf16 %v1008_v54, %v1007_v53  ;;  %v1066_v13 = vmax.f32 %v810_v6, 0.0 }
 0x115   :  { %v1121_v3 = vpack.c.bf16 %v1006_v60, %v1005_v59  ;;  %v3503_v4 = vpop.f32.mrb[28].mxu0  ;;  %v4527_v16 = vpack.c.bf16 %v1068_v10, %v1067_v0 }
 0x116   :  { %v591_v8 = vadd.f32 %v3503_v4, %v4430_v7  ;;  %v582_v9 = vpop.f32.mrb[29].mxu0  ;;  %v4530_v20 = vpack.c.bf16 %v1066_v13, %v1065_v5  ;;  %v3563_v22 = vpop.f32.mrb[24].mxu1 }
 0x117   :  { %v583_v11 = vadd.f32 %v4430_v7, %v582_v9  ;;  %v3504_v12 = vpop.f32.mrb[30].mxu0  ;;  %3633 = vmatprep.mubr.msk.bf16.mxu1 %vm1212_vm1, %v1121_v3  ;;  %v831_v26 = vadd.f32 %v3563_v22, %v4430_v7  ;;  %v822_v27 = vpop.f32.mrb[25].mxu1 }
 0x118   :  { %v594_v14 = vadd.f32 %v3504_v12, %v4430_v7  ;;  %v585_v15 = vpop.f32.mrb[31].mxu0  ;;  %3634 = vmatmul.mubr.msk.bf16.gmra.mrb[88].mxu1 %vm1212_vm1, %v1122_v63  ;;  %v1011_v24 = vmax.f32 %v591_v8, 0.0  ;;  %v823_v30 = vadd.f32 %v4430_v7, %v822_v27  ;;  %v3564_v31 = vpop.f32.mrb[26].mxu1 }
 0x119   :  { %v586_v18 = vadd.f32 %v4430_v7, %v585_v15  ;;  %v1009_v28 = vmax.f32 %v583_v11, 0.0  ;;  %v1071_v33 = vmax.f32 %v831_v26, 0.0  ;;  %v834_v34 = vadd.f32 %v3564_v31, %v4430_v7  ;;  %v825_v35 = vpop.f32.mrb[27].mxu1 }
 0x11a   :  { %v1012_v25 = vmax.f32 %v594_v14, 0.0  ;;  %v1069_v38 = vmax.f32 %v823_v30, 0.0  ;;  %v826_v39 = vadd.f32 %v4430_v7, %v825_v35 }
 0x11b   :  { %v1010_v29 = vmax.f32 %v586_v18, 0.0  ;;  %v1072_v42 = vmax.f32 %v834_v34, 0.0 }
 0x11c   :  { %v1124_v32 = vpack.c.bf16 %v1012_v25, %v1011_v24  ;;  %v1070_v45 = vmax.f32 %v826_v39, 0.0 }
 0x11d   :  { %v1123_v36 = vpack.c.bf16 %v1010_v29, %v1009_v28  ;;  %v3507_v37 = vpop.f32.mrb[32].mxu0  ;;  %v4541_v52 = vpack.c.bf16 %v1072_v42, %v1071_v33 }
 0x11e   :  { %v607_v40 = vadd.f32 %v3507_v37, %v4430_v7  ;;  %v598_v41 = vpop.f32.mrb[33].mxu0  ;;  %v4544_v54 = vpack.c.bf16 %v1070_v45, %v1069_v38  ;;  %v3567_v55 = vpop.f32.mrb[28].mxu1 }
 0x11f   :  { %v599_v43 = vadd.f32 %v4430_v7, %v598_v41  ;;  %v3508_v44 = vpop.f32.mrb[34].mxu0  ;;  %3637 = vmatprep.mubr.msk.bf16.mxu1 %vm1212_vm1, %v1123_v36  ;;  %v847_v61 = vadd.f32 %v3567_v55, %v4430_v7  ;;  %v838_v62 = vpop.f32.mrb[29].mxu1 }
 0x120   :  { %v610_v46 = vadd.f32 %v3508_v44, %v4430_v7  ;;  %v601_v48 = vpop.f32.mrb[35].mxu0  ;;  %3638 = vmatmul.mubr.msk.bf16.gmra.mrb[92].mxu1 %vm1212_vm1, %v1124_v32  ;;  %v1015_v59 = vmax.f32 %v607_v40, 0.0  ;;  %v839_v1 = vadd.f32 %v4430_v7, %v838_v62  ;;  %v3568_v2 = vpop.f32.mrb[30].mxu1 }
 0x121   :  { %v602_v53 = vadd.f32 %v4430_v7, %v601_v48  ;;  %v1013_v63 = vmax.f32 %v599_v43, 0.0  ;;  %v1075_v4 = vmax.f32 %v847_v61, 0.0  ;;  %v850_v5 = vadd.f32 %v3568_v2, %v4430_v7  ;;  %v841_v6 = vpop.f32.mrb[31].mxu1 }
 0x122   :  { %v1016_v60 = vmax.f32 %v610_v46, 0.0  ;;  %v1073_v10 = vmax.f32 %v839_v1, 0.0  ;;  %v842_v11 = vadd.f32 %v4430_v7, %v841_v6 }
 0x123   :  { %v1014_v0 = vmax.f32 %v602_v53, 0.0  ;;  %v1076_v14 = vmax.f32 %v850_v5, 0.0 }
 0x124   :  { %v1126_v3 = vpack.c.bf16 %v1016_v60, %v1015_v59  ;;  %v1074_v22 = vmax.f32 %v842_v11, 0.0 }
 0x125   :  { %v1125_v8 = vpack.c.bf16 %v1014_v0, %v1013_v63  ;;  %v3511_v9 = vpop.f32.mrb[36].mxu0  ;;  %v4558_v26 = vpack.c.bf16 %v1076_v14, %v1075_v4 }
 0x126   :  { %v623_v12 = vadd.f32 %v3511_v9, %v4430_v7  ;;  %v614_v13 = vpop.f32.mrb[37].mxu0  ;;  %v4561_v28 = vpack.c.bf16 %v1074_v22, %v1073_v10  ;;  %v3571_v29 = vpop.f32.mrb[32].mxu1 }
 0x127   :  { %v615_v15 = vadd.f32 %v4430_v7, %v614_v13  ;;  %v3512_v18 = vpop.f32.mrb[38].mxu0  ;;  %3641 = vmatprep.mubr.msk.bf16.mxu1 %vm1212_vm1, %v1125_v8  ;;  %v863_v32 = vadd.f32 %v3571_v29, %v4430_v7  ;;  %v854_v33 = vpop.f32.mrb[33].mxu1 }
 0x128   :  { %v626_v24 = vadd.f32 %v3512_v18, %v4430_v7  ;;  %v617_v25 = vpop.f32.mrb[39].mxu0  ;;  %3642 = vmatmul.mubr.msk.bf16.gmra.mrb[96].mxu1 %vm1212_vm1, %v1126_v3  ;;  %v1019_v30 = vmax.f32 %v623_v12, 0.0  ;;  %v855_v36 = vadd.f32 %v4430_v7, %v854_v33  ;;  %v3572_v37 = vpop.f32.mrb[34].mxu1 }
 0x129   :  { %v618_v27 = vadd.f32 %v4430_v7, %v617_v25  ;;  %v1017_v34 = vmax.f32 %v615_v15, 0.0  ;;  %v1079_v39 = vmax.f32 %v863_v32, 0.0  ;;  %v866_v40 = vadd.f32 %v3572_v37, %v4430_v7  ;;  %v857_v41 = vpop.f32.mrb[35].mxu1 }
 0x12a   :  { %v1020_v31 = vmax.f32 %v626_v24, 0.0  ;;  %v1077_v44 = vmax.f32 %v855_v36, 0.0  ;;  %v858_v45 = vadd.f32 %v4430_v7, %v857_v41 }
 0x12b   :  { %v1018_v35 = vmax.f32 %v618_v27, 0.0  ;;  %v1080_v53 = vmax.f32 %v866_v40, 0.0 }
 0x12c   :  { %v1128_v38 = vpack.c.bf16 %v1020_v31, %v1019_v30  ;;  %v1078_v59 = vmax.f32 %v858_v45, 0.0 }
 0x12d   :  { %v1127_v42 = vpack.c.bf16 %v1018_v35, %v1017_v34  ;;  %v3515_v43 = vpop.f32.mrb[40].mxu0  ;;  %v4572_v62 = vpack.c.bf16 %v1080_v53, %v1079_v39 }
 0x12e   :  { %v639_v46 = vadd.f32 %v3515_v43, %v4430_v7  ;;  %v630_v48 = vpop.f32.mrb[41].mxu0  ;;  %v4575_v0 = vpack.c.bf16 %v1078_v59, %v1077_v44  ;;  %v3575_v1 = vpop.f32.mrb[36].mxu1 }
 0x12f   :  { %v631_v55 = vadd.f32 %v4430_v7, %v630_v48  ;;  %v3516_v57 = vpop.f32.mrb[42].mxu0  ;;  %3645 = vmatprep.mubr.msk.bf16.mxu1 %vm1212_vm1, %v1127_v42  ;;  %v879_v4 = vadd.f32 %v3575_v1, %v4430_v7  ;;  %v870_v5 = vpop.f32.mrb[37].mxu1 }
 0x130   :  { %v642_v60 = vadd.f32 %v3516_v57, %v4430_v7  ;;  %v633_v61 = vpop.f32.mrb[43].mxu0  ;;  %3646 = vmatmul.mubr.msk.bf16.gmra.mrb[100].mxu1 %vm1212_vm1, %v1128_v38  ;;  %v1023_v2 = vmax.f32 %v639_v46, 0.0  ;;  %v871_v9 = vadd.f32 %v4430_v7, %v870_v5  ;;  %v3576_v10 = vpop.f32.mrb[38].mxu1 }
 0x131   :  { %v634_v63 = vadd.f32 %v4430_v7, %v633_v61  ;;  %v1021_v6 = vmax.f32 %v631_v55, 0.0  ;;  %v1083_v12 = vmax.f32 %v879_v4, 0.0  ;;  %v882_v13 = vadd.f32 %v3576_v10, %v4430_v7  ;;  %v873_v14 = vpop.f32.mrb[39].mxu1 }
 0x132   :  { %v1024_v3 = vmax.f32 %v642_v60, 0.0  ;;  %v1081_v22 = vmax.f32 %v871_v9, 0.0  ;;  %v874_v24 = vadd.f32 %v4430_v7, %v873_v14 }
 0x133   :  { %v1022_v8 = vmax.f32 %v634_v63, 0.0  ;;  %v1084_v29 = vmax.f32 %v882_v13, 0.0 }
 0x134   :  { %v1130_v11 = vpack.c.bf16 %v1024_v3, %v1023_v2  ;;  %v1082_v32 = vmax.f32 %v874_v24, 0.0 }
 0x135   :  { %v1129_v15 = vpack.c.bf16 %v1022_v8, %v1021_v6  ;;  %v3519_v18 = vpop.f32.mrb[44].mxu0  ;;  %v4586_v35 = vpack.c.bf16 %v1084_v29, %v1083_v12 }
 0x136   :  { %v655_v25 = vadd.f32 %v3519_v18, %v4430_v7  ;;  %v646_v27 = vpop.f32.mrb[45].mxu0  ;;  %v4589_v37 = vpack.c.bf16 %v1082_v32, %v1081_v22  ;;  %v3579_v38 = vpop.f32.mrb[40].mxu1 }
 0x137   :  { %v647_v30 = vadd.f32 %v4430_v7, %v646_v27  ;;  %v3520_v31 = vpop.f32.mrb[46].mxu0  ;;  %3649 = vmatprep.mubr.msk.bf16.mxu1 %vm1212_vm1, %v1129_v15  ;;  %v895_v41 = vadd.f32 %v3579_v38, %v4430_v7  ;;  %v886_v42 = vpop.f32.mrb[41].mxu1 }
 0x138   :  { %v658_v33 = vadd.f32 %v3520_v31, %v4430_v7  ;;  %v649_v34 = vpop.f32.mrb[47].mxu0  ;;  %3650 = vmatmul.mubr.msk.bf16.gmra.mrb[104].mxu1 %vm1212_vm1, %v1130_v11  ;;  %v1027_v39 = vmax.f32 %v655_v25, 0.0  ;;  %v887_v45 = vadd.f32 %v4430_v7, %v886_v42  ;;  %v3580_v46 = vpop.f32.mrb[42].mxu1 }
 0x139   :  { %v650_v36 = vadd.f32 %v4430_v7, %v649_v34  ;;  %v1025_v43 = vmax.f32 %v647_v30, 0.0  ;;  %v1087_v53 = vmax.f32 %v895_v41, 0.0  ;;  %v898_v55 = vadd.f32 %v3580_v46, %v4430_v7  ;;  %v889_v57 = vpop.f32.mrb[43].mxu1 }
 0x13a   :  { %v1028_v40 = vmax.f32 %v658_v33, 0.0  ;;  %v1085_v61 = vmax.f32 %v887_v45, 0.0  ;;  %v890_v63 = vadd.f32 %v4430_v7, %v889_v57 }
 0x13b   :  { %v1026_v44 = vmax.f32 %v650_v36, 0.0  ;;  %v1088_v3 = vmax.f32 %v898_v55, 0.0 }
 0x13c   :  { %v1132_v48 = vpack.c.bf16 %v1028_v40, %v1027_v39  ;;  %v1086_v6 = vmax.f32 %v890_v63, 0.0 }
 0x13d   :  { %v1131_v59 = vpack.c.bf16 %v1026_v44, %v1025_v43  ;;  %v3523_v60 = vpop.f32.mrb[48].mxu0  ;;  %v4600_v10 = vpack.c.bf16 %v1088_v3, %v1087_v53 }
 0x13e   :  { %v671_v1 = vadd.f32 %v3523_v60, %v4430_v7  ;;  %v662_v2 = vpop.f32.mrb[49].mxu0  ;;  %v4603_v12 = vpack.c.bf16 %v1086_v6, %v1085_v61  ;;  %v3583_v13 = vpop.f32.mrb[44].mxu1 }
 0x13f   :  { %v663_v4 = vadd.f32 %v4430_v7, %v662_v2  ;;  %v3524_v5 = vpop.f32.mrb[50].mxu0  ;;  %3653 = vmatprep.mubr.msk.bf16.mxu1 %vm1212_vm1, %v1131_v59  ;;  %v911_v18 = vadd.f32 %v3583_v13, %v4430_v7  ;;  %v902_v22 = vpop.f32.mrb[45].mxu1 }
 0x140   :  { %v674_v8 = vadd.f32 %v3524_v5, %v4430_v7  ;;  %v665_v9 = vpop.f32.mrb[51].mxu0  ;;  %3654 = vmatmul.mubr.msk.bf16.gmra.mrb[108].mxu1 %vm1212_vm1, %v1132_v48  ;;  %v1031_v14 = vmax.f32 %v671_v1, 0.0  ;;  %v903_v27 = vadd.f32 %v4430_v7, %v902_v22  ;;  %v3584_v29 = vpop.f32.mrb[46].mxu1 }
 0x141   :  { %v666_v11 = vadd.f32 %v4430_v7, %v665_v9  ;;  %v1029_v24 = vmax.f32 %v663_v4, 0.0  ;;  %v1091_v31 = vmax.f32 %v911_v18, 0.0  ;;  %v914_v32 = vadd.f32 %v3584_v29, %v4430_v7  ;;  %v905_v33 = vpop.f32.mrb[47].mxu1 }
 0x142   :  { %v1032_v15 = vmax.f32 %v674_v8, 0.0  ;;  %v1089_v38 = vmax.f32 %v903_v27, 0.0  ;;  %v906_v39 = vadd.f32 %v4430_v7, %v905_v33 }
 0x143   :  { %v1030_v25 = vmax.f32 %v666_v11, 0.0  ;;  %v1092_v42 = vmax.f32 %v914_v32, 0.0 }
 0x144   :  { %v1134_v30 = vpack.c.bf16 %v1032_v15, %v1031_v14  ;;  %v1090_v45 = vmax.f32 %v906_v39, 0.0 }
 0x145   :  { %v1133_v34 = vpack.c.bf16 %v1030_v25, %v1029_v24  ;;  %v3527_v36 = vpop.f32.mrb[52].mxu0  ;;  %v4614_v53 = vpack.c.bf16 %v1092_v42, %v1091_v31 }
 0x146   :  { %v687_v40 = vadd.f32 %v3527_v36, %v4430_v7  ;;  %v678_v41 = vpop.f32.mrb[53].mxu0  ;;  %v4617_v57 = vpack.c.bf16 %v1090_v45, %v1089_v38  ;;  %v3587_v59 = vpop.f32.mrb[48].mxu1 }
 0x147   :  { %v679_v43 = vadd.f32 %v4430_v7, %v678_v41  ;;  %v3528_v44 = vpop.f32.mrb[54].mxu0  ;;  %3657 = vmatprep.mubr.msk.bf16.mxu1 %vm1212_vm1, %v1133_v34  ;;  %v927_v63 = vadd.f32 %v3587_v59, %v4430_v7  ;;  %v918_v1 = vpop.f32.mrb[49].mxu1 }
 0x148   :  { %v690_v46 = vadd.f32 %v3528_v44, %v4430_v7  ;;  %v681_v48 = vpop.f32.mrb[55].mxu0  ;;  %3658 = vmatmul.mubr.msk.bf16.gmra.mrb[112].mxu1 %vm1212_vm1, %v1134_v30  ;;  %v1035_v60 = vmax.f32 %v687_v40, 0.0  ;;  %v919_v4 = vadd.f32 %v4430_v7, %v918_v1  ;;  %v3588_v5 = vpop.f32.mrb[50].mxu1 }
 0x149   :  { %v682_v55 = vadd.f32 %v4430_v7, %v681_v48  ;;  %v1033_v2 = vmax.f32 %v679_v43, 0.0  ;;  %v1095_v8 = vmax.f32 %v927_v63, 0.0  ;;  %v930_v9 = vadd.f32 %v3588_v5, %v4430_v7  ;;  %v921_v11 = vpop.f32.mrb[51].mxu1 }
 0x14a   :  { %v1036_v61 = vmax.f32 %v690_v46, 0.0  ;;  %v1093_v15 = vmax.f32 %v919_v4, 0.0  ;;  %v922_v18 = vadd.f32 %v4430_v7, %v921_v11 }
 0x14b   :  { %v1034_v3 = vmax.f32 %v682_v55, 0.0  ;;  %v1096_v25 = vmax.f32 %v930_v9, 0.0 }
 0x14c   :  { %v1136_v6 = vpack.c.bf16 %v1036_v61, %v1035_v60  ;;  %v1094_v30 = vmax.f32 %v922_v18, 0.0 }
 0x14d   :  { %v1135_v13 = vpack.c.bf16 %v1034_v3, %v1033_v2  ;;  %v3531_v14 = vpop.f32.mrb[56].mxu0  ;;  %v4628_v33 = vpack.c.bf16 %v1096_v25, %v1095_v8 }
 0x14e   :  { %v703_v22 = vadd.f32 %v3531_v14, %v4430_v7  ;;  %v694_v24 = vpop.f32.mrb[57].mxu0  ;;  %v4631_v36 = vpack.c.bf16 %v1094_v30, %v1093_v15  ;;  %v3591_v38 = vpop.f32.mrb[52].mxu1 }
 0x14f   :  { %v695_v27 = vadd.f32 %v4430_v7, %v694_v24  ;;  %v3532_v29 = vpop.f32.mrb[58].mxu0  ;;  %3661 = vmatprep.mubr.msk.bf16.mxu1 %vm1212_vm1, %v1135_v13  ;;  %v943_v41 = vadd.f32 %v3591_v38, %v4430_v7  ;;  %v934_v42 = vpop.f32.mrb[53].mxu1 }
 0x150   :  { %v706_v31 = vadd.f32 %v3532_v29, %v4430_v7  ;;  %v697_v32 = vpop.f32.mrb[59].mxu0  ;;  %3662 = vmatmul.mubr.msk.bf16.gmra.mrb[116].mxu1 %vm1212_vm1, %v1136_v6  ;;  %v1039_v39 = vmax.f32 %v703_v22, 0.0  ;;  %v935_v45 = vadd.f32 %v4430_v7, %v934_v42  ;;  %v3592_v46 = vpop.f32.mrb[54].mxu1 }
 0x151   :  { %v698_v34 = vadd.f32 %v4430_v7, %v697_v32  ;;  %v1037_v43 = vmax.f32 %v695_v27, 0.0  ;;  %v1099_v55 = vmax.f32 %v943_v41, 0.0  ;;  %v946_v59 = vadd.f32 %v3592_v46, %v4430_v7  ;;  %v937_v60 = vpop.f32.mrb[55].mxu1 }
 0x152   :  { %v1040_v40 = vmax.f32 %v706_v31, 0.0  ;;  %v1097_v1 = vmax.f32 %v935_v45, 0.0  ;;  %v938_v2 = vadd.f32 %v4430_v7, %v937_v60 }
 0x153   :  { %v1038_v44 = vmax.f32 %v698_v34, 0.0  ;;  %v1100_v5 = vmax.f32 %v946_v59, 0.0 }
 0x154   :  { %v1138_v48 = vpack.c.bf16 %v1040_v40, %v1039_v39  ;;  %v1098_v9 = vmax.f32 %v938_v2, 0.0 }
 0x155   :  { %v1137_v61 = vpack.c.bf16 %v1038_v44, %v1037_v43  ;;  %v3535_v63 = vpop.f32.mrb[60].mxu0  ;;  %v4642_v14 = vpack.c.bf16 %v1100_v5, %v1099_v55 }
 0x156   :  { %v719_v3 = vadd.f32 %v3535_v63, %v4430_v7  ;;  %v710_v4 = vpop.f32.mrb[61].mxu0  ;;  %v4645_v18 = vpack.c.bf16 %v1098_v9, %v1097_v1  ;;  %v3595_v22 = vpop.f32.mrb[56].mxu1 }
 0x157   :  { %v711_v6 = vadd.f32 %v4430_v7, %v710_v4  ;;  %v3536_v8 = vpop.f32.mrb[62].mxu0  ;;  %3665 = vmatprep.mubr.msk.bf16.mxu1 %vm1212_vm1, %v1137_v61  ;;  %v959_v27 = vadd.f32 %v3595_v22, %v4430_v7  ;;  %v950_v29 = vpop.f32.mrb[57].mxu1 }
 0x158   :  { %v722_v11 = vadd.f32 %v3536_v8, %v4430_v7  ;;  %v713_v13 = vpop.f32.mrb[63].mxu0  ;;  %3666 = vmatmul.mubr.msk.bf16.gmra.mrb[120].mxu1 %vm1212_vm1, %v1138_v48  ;;  %v1043_v24 = vmax.f32 %v719_v3, 0.0  ;;  %v951_v32 = vadd.f32 %v4430_v7, %v950_v29  ;;  %v3596_v34 = vpop.f32.mrb[58].mxu1 }
 0x159   :  { %v714_v15 = vadd.f32 %v4430_v7, %v713_v13  ;;  %v1041_v30 = vmax.f32 %v711_v6, 0.0  ;;  %v1103_v39 = vmax.f32 %v959_v27, 0.0  ;;  %v962_v40 = vadd.f32 %v3596_v34, %v4430_v7  ;;  %v953_v41 = vpop.f32.mrb[59].mxu1 }
 0x15a   :  { %v1044_v25 = vmax.f32 %v722_v11, 0.0  ;;  %v1101_v43 = vmax.f32 %v951_v32, 0.0  ;;  %v954_v44 = vadd.f32 %v4430_v7, %v953_v41 }
 0x15b   :  { %v1042_v31 = vmax.f32 %v714_v15, 0.0  ;;  %v1104_v45 = vmax.f32 %v962_v40, 0.0 }
 0x15c   :  { %v1140_v38 = vpack.c.bf16 %v1044_v25, %v1043_v24  ;;  %v1102_v46 = vmax.f32 %v954_v44, 0.0 }
 0x15d   :  { %v1139_v42 = vpack.c.bf16 %v1042_v31, %v1041_v30  ;;  %v4653_v48 = vpack.c.bf16 %v1104_v45, %v1103_v39 }
 0x15e   :  { %v4657_v55 = vpack.c.bf16 %v1102_v46, %v1101_v43  ;;  %v3599_v59 = vpop.f32.mrb[60].mxu1 }
 0x15f   :  { %3669 = vmatprep.mubr.msk.bf16.mxu1 %vm1212_vm1, %v1139_v42  ;;  %v975_v60 = vadd.f32 %v3599_v59, %v4430_v7  ;;  %v966_v61 = vpop.f32.mrb[61].mxu1 }
 0x160   :  { %3670 = vmatmul.mubr.msk.bf16.gmra.mrb[124].mxu1 %vm1212_vm1, %v1140_v38  ;;  %v967_v63 = vadd.f32 %v4430_v7, %v966_v61  ;;  %v3600_v1 = vpop.f32.mrb[62].mxu1 }
 0x161   :  { %3673 = vmatprep.mubr.msk.bf16.mxu1 %vm1212_vm1, %v4457_v58  ;;  %v1107_v2 = vmax.f32 %v975_v60, 0.0  ;;  %v978_v3 = vadd.f32 %v3600_v1, %v4430_v7  ;;  %v969_v4 = vpop.f32.mrb[63].mxu1 }
 0x162   :  { %v1105_v5 = vmax.f32 %v967_v63, 0.0  ;;  %v970_v6 = vadd.f32 %v4430_v7, %v969_v4  ;;  %v4714_v7 = vld [vmem:[%s5070_s4] ss:$0 sm:$0xff] }
 0x163   :  { %v1108_v8 = vmax.f32 %v978_v3, 0.0 }
 0x164   :  { %v1106_v9 = vmax.f32 %v970_v6, 0.0 }
 0x165   :  { %v4665_v58 = vpack.c.bf16 %v1108_v8, %v1107_v2 }
 0x166   :  { %v4669_v11 = vpack.c.bf16 %v1106_v9, %v1105_v5 }
 0x168   :  { %3674 = vmatmul.mubr.msk.bf16.gmra.mrb[128].mxu1 %vm1212_vm1, %v4454_v56 }
 0x169   :  { %3677 = vmatprep.mubr.msk.bf16.mxu1 %vm1212_vm1, %v4471_v23 }
 0x170   :  { %3678 = vmatmul.mubr.msk.bf16.gmra.mrb[132].mxu1 %vm1212_vm1, %v4468_v21 }
 0x171   :  { %3681 = vmatprep.mubr.msk.bf16.mxu1 %vm1212_vm1, %v4485_v51 }
 0x178   :  { %3682 = vmatmul.mubr.msk.bf16.gmra.mrb[136].mxu1 %vm1212_vm1, %v4482_v49 }
 0x179   :  { %3685 = vmatprep.mubr.msk.bf16.mxu1 %vm1212_vm1, %v4502_v19 }
 0x180   :  { %3686 = vmatmul.mubr.msk.bf16.gmra.mrb[140].mxu1 %vm1212_vm1, %v4499_v17 }
 0x181   :  { %3689 = vmatprep.mubr.msk.bf16.mxu1 %vm1212_vm1, %v4516_v50 }
 0x188   :  { %3690 = vmatmul.mubr.msk.bf16.gmra.mrb[144].mxu1 %vm1212_vm1, %v4513_v47 }
 0x189   :  { %3693 = vmatprep.mubr.msk.bf16.mxu1 %vm1212_vm1, %v4530_v20 }
 0x190   :  { %3694 = vmatmul.mubr.msk.bf16.gmra.mrb[148].mxu1 %vm1212_vm1, %v4527_v16 }
 0x191   :  { %3697 = vmatprep.mubr.msk.bf16.mxu1 %vm1212_vm1, %v4544_v54 }
 0x198   :  { %3698 = vmatmul.mubr.msk.bf16.gmra.mrb[152].mxu1 %vm1212_vm1, %v4541_v52 }
 0x199   :  { %3701 = vmatprep.mubr.msk.bf16.mxu1 %vm1212_vm1, %v4561_v28 }
 0x1a0   :  { %3702 = vmatmul.mubr.msk.bf16.gmra.mrb[156].mxu1 %vm1212_vm1, %v4558_v26 }
 0x1a1   :  { %3705 = vmatprep.mubr.msk.bf16.mxu1 %vm1212_vm1, %v4575_v0 }
 0x1a8   :  { %3706 = vmatmul.mubr.msk.bf16.gmra.mrb[160].mxu1 %vm1212_vm1, %v4572_v62 }
 0x1a9   :  { %3709 = vmatprep.mubr.msk.bf16.mxu1 %vm1212_vm1, %v4589_v37 }
 0x1b0   :  { %3710 = vmatmul.mubr.msk.bf16.gmra.mrb[164].mxu1 %vm1212_vm1, %v4586_v35 }
 0x1b1   :  { %3713 = vmatprep.mubr.msk.bf16.mxu1 %vm1212_vm1, %v4603_v12 }
 0x1b8   :  { %3714 = vmatmul.mubr.msk.bf16.gmra.mrb[168].mxu1 %vm1212_vm1, %v4600_v10 }
 0x1b9   :  { %3717 = vmatprep.mubr.msk.bf16.mxu1 %vm1212_vm1, %v4617_v57 }
 0x1bb   :  { %v3611_v56 = vpop.f32.mrb[64].mxu1 }
 0x1bc   :  { %v1448_v21 = vadd.f32 %v3611_v56, %v4714_v7  ;;  %v1439_v23 = vpop.f32.mrb[65].mxu1 }
 0x1bd   :  { %v1440_v49 = vadd.f32 %v4714_v7, %v1439_v23  ;;  %v3612_v51 = vpop.f32.mrb[66].mxu1 }
 0x1be   :  { %v1451_v17 = vadd.f32 %v3612_v51, %v4714_v7  ;;  %v1442_v19 = vpop.f32.mrb[67].mxu1  ;;  %v1952_v50 = vmax.f32 %v1448_v21, 0.0 }
 0x1bf   :  { %v1443_v47 = vadd.f32 %v4714_v7, %v1442_v19  ;;  %v1950_v20 = vmax.f32 %v1440_v49, 0.0 }
 0x1c0   :  { %v1953_v16 = vmax.f32 %v1451_v17, 0.0  ;;  %3718 = vmatmul.mubr.msk.bf16.gmra.mrb[172].mxu1 %vm1212_vm1, %v4614_v53 }
 0x1c1   :  { %v1951_v52 = vmax.f32 %v1443_v47, 0.0  ;;  %3721 = vmatprep.mubr.msk.bf16.mxu1 %vm1212_vm1, %v4631_v36 }
 0x1c2   :  { %v2079_v54 = vpack.c.bf16 %v1953_v16, %v1952_v50 }
 0x1c3   :  { %v2078_v26 = vpack.c.bf16 %v1951_v52, %v1950_v20  ;;  %v3615_v28 = vpop.f32.mrb[68].mxu1 }
 0x1c4   :  { %v1464_v62 = vadd.f32 %v3615_v28, %v4714_v7  ;;  %v1455_v0 = vpop.f32.mrb[69].mxu1 }
 0x1c5   :  { %v1456_v35 = vadd.f32 %v4714_v7, %v1455_v0  ;;  %v3616_v37 = vpop.f32.mrb[70].mxu1  ;;  %3745 = vmatprep.mubr.msk.bf16.mxu0 %vm1212_vm1, %v2078_v26 }
 0x1c6   :  { %v1467_v10 = vadd.f32 %v3616_v37, %v4714_v7  ;;  %v1458_v12 = vpop.f32.mrb[71].mxu1  ;;  %3746 = vmatmul.mubr.msk.bf16.vlgmr.msra.gmra.mrb[64].mxu0 %vm1212_vm1, %v2079_v54  ;;  %v1956_v57 = vmax.f32 %v1464_v62, 0.0 }
 0x1c7   :  { %v1459_v53 = vadd.f32 %v4714_v7, %v1458_v12  ;;  %v1954_v13 = vmax.f32 %v1456_v35, 0.0 }
 0x1c8   :  { %v1957_v36 = vmax.f32 %v1467_v10, 0.0  ;;  %3722 = vmatmul.mubr.msk.bf16.gmra.mrb[176].mxu1 %vm1212_vm1, %v4628_v33 }
 0x1c9   :  { %v1955_v15 = vmax.f32 %v1459_v53, 0.0  ;;  %3725 = vmatprep.mubr.msk.bf16.mxu1 %vm1212_vm1, %v4645_v18 }
 0x1ca   :  { %v2081_v22 = vpack.c.bf16 %v1957_v36, %v1956_v57 }
 0x1cb   :  { %v2080_v24 = vpack.c.bf16 %v1955_v15, %v1954_v13  ;;  %v3619_v25 = vpop.f32.mrb[72].mxu1 }
 0x1cc   :  { %v1480_v27 = vadd.f32 %v3619_v25, %v4714_v7  ;;  %v1471_v29 = vpop.f32.mrb[73].mxu1 }
 0x1cd   :  { %v1472_v30 = vadd.f32 %v4714_v7, %v1471_v29  ;;  %v3620_v31 = vpop.f32.mrb[74].mxu1  ;;  %3749 = vmatprep.mubr.msk.bf16.mxu0 %vm1212_vm1, %v2080_v24 }
 0x1ce   :  { %v1483_v32 = vadd.f32 %v3620_v31, %v4714_v7  ;;  %v1474_v34 = vpop.f32.mrb[75].mxu1  ;;  %3750 = vmatmul.mubr.msk.bf16.gmra.mrb[68].mxu0 %vm1212_vm1, %v2081_v22  ;;  %v1960_v38 = vmax.f32 %v1480_v27, 0.0 }
 0x1cf   :  { %v1475_v33 = vadd.f32 %v4714_v7, %v1474_v34  ;;  %v1958_v39 = vmax.f32 %v1472_v30, 0.0 }
 0x1d0   :  { %v1961_v18 = vmax.f32 %v1483_v32, 0.0  ;;  %3726 = vmatmul.mubr.msk.bf16.gmra.mrb[180].mxu1 %vm1212_vm1, %v4642_v14 }
 0x1d1   :  { %v1959_v40 = vmax.f32 %v1475_v33, 0.0  ;;  %3729 = vmatprep.mubr.msk.bf16.mxu1 %vm1212_vm1, %v4657_v55 }
 0x1d2   :  { %v2083_v41 = vpack.c.bf16 %v1961_v18, %v1960_v38 }
 0x1d3   :  { %v2082_v42 = vpack.c.bf16 %v1959_v40, %v1958_v39  ;;  %v3623_v43 = vpop.f32.mrb[76].mxu1 }
 0x1d4   :  { %v1496_v44 = vadd.f32 %v3623_v43, %v4714_v7  ;;  %v1487_v45 = vpop.f32.mrb[77].mxu1 }
 0x1d5   :  { %v1488_v46 = vadd.f32 %v4714_v7, %v1487_v45  ;;  %v3624_v59 = vpop.f32.mrb[78].mxu1  ;;  %3753 = vmatprep.mubr.msk.bf16.mxu0 %vm1212_vm1, %v2082_v42 }
 0x1d6   :  { %v1499_v60 = vadd.f32 %v3624_v59, %v4714_v7  ;;  %v1490_v61 = vpop.f32.mrb[79].mxu1  ;;  %3754 = vmatmul.mubr.msk.bf16.gmra.mrb[72].mxu0 %vm1212_vm1, %v2083_v41  ;;  %v1964_v63 = vmax.f32 %v1496_v44, 0.0 }
 0x1d7   :  { %v1491_v14 = vadd.f32 %v4714_v7, %v1490_v61  ;;  %v1962_v1 = vmax.f32 %v1488_v46, 0.0 }
 0x1d8   :  { %v1965_v55 = vmax.f32 %v1499_v60, 0.0  ;;  %3730 = vmatmul.mubr.msk.bf16.gmra.mrb[184].mxu1 %vm1212_vm1, %v4653_v48 }
 0x1d9   :  { %v1963_v2 = vmax.f32 %v1491_v14, 0.0  ;;  %3733 = vmatprep.mubr.msk.bf16.mxu1 %vm1212_vm1, %v4669_v11 }
 0x1da   :  { %v2085_v3 = vpack.c.bf16 %v1965_v55, %v1964_v63 }
 0x1db   :  { %v2084_v4 = vpack.c.bf16 %v1963_v2, %v1962_v1  ;;  %v3627_v5 = vpop.f32.mrb[80].mxu1 }
 0x1dc   :  { %v1512_v6 = vadd.f32 %v3627_v5, %v4714_v7  ;;  %v1503_v8 = vpop.f32.mrb[81].mxu1 }
 0x1dd   :  { %v1504_v9 = vadd.f32 %v4714_v7, %v1503_v8  ;;  %v3628_v56 = vpop.f32.mrb[82].mxu1  ;;  %3757 = vmatprep.mubr.msk.bf16.mxu0 %vm1212_vm1, %v2084_v4 }
 0x1de   :  { %v1515_v21 = vadd.f32 %v3628_v56, %v4714_v7  ;;  %v1506_v23 = vpop.f32.mrb[83].mxu1  ;;  %3758 = vmatmul.mubr.msk.bf16.gmra.mrb[76].mxu0 %vm1212_vm1, %v2085_v3  ;;  %v1968_v49 = vmax.f32 %v1512_v6, 0.0 }
 0x1df   :  { %v1507_v48 = vadd.f32 %v4714_v7, %v1506_v23  ;;  %v1966_v51 = vmax.f32 %v1504_v9, 0.0 }
 0x1e0   :  { %v1969_v11 = vmax.f32 %v1515_v21, 0.0  ;;  %3734 = vmatmul.mubr.msk.bf16.gmra.mrb[188].mxu1 %vm1212_vm1, %v4665_v58 }
 0x1e1   :  { %v1967_v17 = vmax.f32 %v1507_v48, 0.0 }
 0x1e2   :  { %v2087_v19 = vpack.c.bf16 %v1969_v11, %v1968_v49 }
 0x1e3   :  { %v2086_v47 = vpack.c.bf16 %v1967_v17, %v1966_v51  ;;  %v3631_v50 = vpop.f32.mrb[84].mxu1 }
 0x1e4   :  { %v1528_v16 = vadd.f32 %v3631_v50, %v4714_v7  ;;  %v1519_v20 = vpop.f32.mrb[85].mxu1 }
 0x1e5   :  { %v1520_v52 = vadd.f32 %v4714_v7, %v1519_v20  ;;  %v3632_v54 = vpop.f32.mrb[86].mxu1  ;;  %3761 = vmatprep.mubr.msk.bf16.mxu0 %vm1212_vm1, %v2086_v47 }
 0x1e6   :  { %v1531_v26 = vadd.f32 %v3632_v54, %v4714_v7  ;;  %v1522_v28 = vpop.f32.mrb[87].mxu1  ;;  %3762 = vmatmul.mubr.msk.bf16.gmra.mrb[80].mxu0 %vm1212_vm1, %v2087_v19  ;;  %v1972_v62 = vmax.f32 %v1528_v16, 0.0 }
 0x1e7   :  { %v1523_v58 = vadd.f32 %v4714_v7, %v1522_v28  ;;  %v1970_v35 = vmax.f32 %v1520_v52, 0.0 }
 0x1e8   :  { %v1973_v0 = vmax.f32 %v1531_v26, 0.0 }
 0x1e9   :  { %v1971_v37 = vmax.f32 %v1523_v58, 0.0 }
 0x1ea   :  { %v2089_v10 = vpack.c.bf16 %v1973_v0, %v1972_v62 }
 0x1eb   :  { %v2088_v12 = vpack.c.bf16 %v1971_v37, %v1970_v35  ;;  %v3635_v53 = vpop.f32.mrb[88].mxu1 }
 0x1ec   :  { %v1544_v57 = vadd.f32 %v3635_v53, %v4714_v7  ;;  %v1535_v36 = vpop.f32.mrb[89].mxu1 }
 0x1ed   :  { %v1536_v13 = vadd.f32 %v4714_v7, %v1535_v36  ;;  %v3636_v15 = vpop.f32.mrb[90].mxu1  ;;  %3765 = vmatprep.mubr.msk.bf16.mxu0 %vm1212_vm1, %v2088_v12 }
 0x1ee   :  { %v1547_v22 = vadd.f32 %v3636_v15, %v4714_v7  ;;  %v1538_v24 = vpop.f32.mrb[91].mxu1  ;;  %3766 = vmatmul.mubr.msk.bf16.gmra.mrb[84].mxu0 %vm1212_vm1, %v2089_v10  ;;  %v1976_v27 = vmax.f32 %v1544_v57, 0.0 }
 0x1ef   :  { %v1539_v25 = vadd.f32 %v4714_v7, %v1538_v24  ;;  %v1974_v30 = vmax.f32 %v1536_v13, 0.0 }
 0x1f0   :  { %v1977_v29 = vmax.f32 %v1547_v22, 0.0 }
 0x1f1   :  { %v1975_v31 = vmax.f32 %v1539_v25, 0.0 }
 0x1f2   :  { %v2091_v32 = vpack.c.bf16 %v1977_v29, %v1976_v27 }
 0x1f3   :  { %v2090_v34 = vpack.c.bf16 %v1975_v31, %v1974_v30  ;;  %v3639_v33 = vpop.f32.mrb[92].mxu1 }
 0x1f4   :  { %v1560_v38 = vadd.f32 %v3639_v33, %v4714_v7  ;;  %v1551_v18 = vpop.f32.mrb[93].mxu1 }
 0x1f5   :  { %v1552_v39 = vadd.f32 %v4714_v7, %v1551_v18  ;;  %v3640_v40 = vpop.f32.mrb[94].mxu1  ;;  %3769 = vmatprep.mubr.msk.bf16.mxu0 %vm1212_vm1, %v2090_v34 }
 0x1f6   :  { %v1563_v41 = vadd.f32 %v3640_v40, %v4714_v7  ;;  %v1554_v42 = vpop.f32.mrb[95].mxu1  ;;  %3770 = vmatmul.mubr.msk.bf16.gmra.mrb[88].mxu0 %vm1212_vm1, %v2091_v32  ;;  %v1980_v44 = vmax.f32 %v1560_v38, 0.0 }
 0x1f7   :  { %v1555_v43 = vadd.f32 %v4714_v7, %v1554_v42  ;;  %v1978_v46 = vmax.f32 %v1552_v39, 0.0 }
 0x1f8   :  { %v1981_v45 = vmax.f32 %v1563_v41, 0.0 }
 0x1f9   :  { %v1979_v59 = vmax.f32 %v1555_v43, 0.0 }
 0x1fa   :  { %v2093_v60 = vpack.c.bf16 %v1981_v45, %v1980_v44 }
 0x1fb   :  { %v2092_v61 = vpack.c.bf16 %v1979_v59, %v1978_v46  ;;  %v3643_v14 = vpop.f32.mrb[96].mxu1 }
 0x1fc   :  { %v1576_v63 = vadd.f32 %v3643_v14, %v4714_v7  ;;  %v1567_v55 = vpop.f32.mrb[97].mxu1 }
 0x1fd   :  { %v1568_v1 = vadd.f32 %v4714_v7, %v1567_v55  ;;  %v3644_v2 = vpop.f32.mrb[98].mxu1  ;;  %3773 = vmatprep.mubr.msk.bf16.mxu0 %vm1212_vm1, %v2092_v61 }
 0x1fe   :  { %v1579_v3 = vadd.f32 %v3644_v2, %v4714_v7  ;;  %v1570_v4 = vpop.f32.mrb[99].mxu1  ;;  %3774 = vmatmul.mubr.msk.bf16.gmra.mrb[92].mxu0 %vm1212_vm1, %v2093_v60  ;;  %v1984_v6 = vmax.f32 %v1576_v63, 0.0 }
 0x1ff   :  { %v1571_v5 = vadd.f32 %v4714_v7, %v1570_v4  ;;  %v1982_v9 = vmax.f32 %v1568_v1, 0.0 }
 0x200   :  { %v1985_v8 = vmax.f32 %v1579_v3, 0.0 }
 0x201   :  { %v1983_v56 = vmax.f32 %v1571_v5, 0.0 }
 0x202   :  { %v2095_v21 = vpack.c.bf16 %v1985_v8, %v1984_v6 }
 0x203   :  { %v2094_v23 = vpack.c.bf16 %v1983_v56, %v1982_v9  ;;  %v3647_v48 = vpop.f32.mrb[100].mxu1 }
 0x204   :  { %v1592_v49 = vadd.f32 %v3647_v48, %v4714_v7  ;;  %v1583_v11 = vpop.f32.mrb[101].mxu1 }
 0x205   :  { %v1584_v51 = vadd.f32 %v4714_v7, %v1583_v11  ;;  %v3648_v17 = vpop.f32.mrb[102].mxu1  ;;  %3777 = vmatprep.mubr.msk.bf16.mxu0 %vm1212_vm1, %v2094_v23 }
 0x206   :  { %v1595_v19 = vadd.f32 %v3648_v17, %v4714_v7  ;;  %v1586_v47 = vpop.f32.mrb[103].mxu1  ;;  %3778 = vmatmul.mubr.msk.bf16.gmra.mrb[96].mxu0 %vm1212_vm1, %v2095_v21  ;;  %v1988_v16 = vmax.f32 %v1592_v49, 0.0 }
 0x207   :  { %v1587_v50 = vadd.f32 %v4714_v7, %v1586_v47  ;;  %v1986_v52 = vmax.f32 %v1584_v51, 0.0 }
 0x208   :  { %v1989_v20 = vmax.f32 %v1595_v19, 0.0 }
 0x209   :  { %v1987_v54 = vmax.f32 %v1587_v50, 0.0 }
 0x20a   :  { %v2097_v26 = vpack.c.bf16 %v1989_v20, %v1988_v16 }
 0x20b   :  { %v2096_v28 = vpack.c.bf16 %v1987_v54, %v1986_v52  ;;  %v3651_v58 = vpop.f32.mrb[104].mxu1 }
 0x20c   :  { %v1608_v62 = vadd.f32 %v3651_v58, %v4714_v7  ;;  %v1599_v0 = vpop.f32.mrb[105].mxu1 }
 0x20d   :  { %v1600_v35 = vadd.f32 %v4714_v7, %v1599_v0  ;;  %v3652_v37 = vpop.f32.mrb[106].mxu1  ;;  %3781 = vmatprep.mubr.msk.bf16.mxu0 %vm1212_vm1, %v2096_v28 }
 0x20e   :  { %v1611_v10 = vadd.f32 %v3652_v37, %v4714_v7  ;;  %v1602_v12 = vpop.f32.mrb[107].mxu1  ;;  %3782 = vmatmul.mubr.msk.bf16.gmra.mrb[100].mxu0 %vm1212_vm1, %v2097_v26  ;;  %v1992_v57 = vmax.f32 %v1608_v62, 0.0 }
 0x20f   :  { %v1603_v53 = vadd.f32 %v4714_v7, %v1602_v12  ;;  %v1990_v13 = vmax.f32 %v1600_v35, 0.0 }
 0x210   :  { %v1993_v36 = vmax.f32 %v1611_v10, 0.0 }
 0x211   :  { %v1991_v15 = vmax.f32 %v1603_v53, 0.0 }
 0x212   :  { %v2099_v22 = vpack.c.bf16 %v1993_v36, %v1992_v57 }
 0x213   :  { %v2098_v24 = vpack.c.bf16 %v1991_v15, %v1990_v13  ;;  %v3655_v25 = vpop.f32.mrb[108].mxu1 }
 0x214   :  { %v1624_v27 = vadd.f32 %v3655_v25, %v4714_v7  ;;  %v1615_v29 = vpop.f32.mrb[109].mxu1 }
 0x215   :  { %v1616_v30 = vadd.f32 %v4714_v7, %v1615_v29  ;;  %v3656_v31 = vpop.f32.mrb[110].mxu1  ;;  %3785 = vmatprep.mubr.msk.bf16.mxu0 %vm1212_vm1, %v2098_v24 }
 0x216   :  { %v1627_v32 = vadd.f32 %v3656_v31, %v4714_v7  ;;  %v1618_v34 = vpop.f32.mrb[111].mxu1  ;;  %3786 = vmatmul.mubr.msk.bf16.gmra.mrb[104].mxu0 %vm1212_vm1, %v2099_v22  ;;  %v1996_v38 = vmax.f32 %v1624_v27, 0.0 }
 0x217   :  { %v1619_v33 = vadd.f32 %v4714_v7, %v1618_v34  ;;  %v1994_v39 = vmax.f32 %v1616_v30, 0.0 }
 0x218   :  { %v1997_v18 = vmax.f32 %v1627_v32, 0.0 }
 0x219   :  { %v1995_v40 = vmax.f32 %v1619_v33, 0.0 }
 0x21a   :  { %v2101_v41 = vpack.c.bf16 %v1997_v18, %v1996_v38 }
 0x21b   :  { %v2100_v42 = vpack.c.bf16 %v1995_v40, %v1994_v39  ;;  %v3659_v43 = vpop.f32.mrb[112].mxu1 }
 0x21c   :  { %v1640_v44 = vadd.f32 %v3659_v43, %v4714_v7  ;;  %v1631_v45 = vpop.f32.mrb[113].mxu1 }
 0x21d   :  { %v1632_v46 = vadd.f32 %v4714_v7, %v1631_v45  ;;  %v3660_v59 = vpop.f32.mrb[114].mxu1  ;;  %3789 = vmatprep.mubr.msk.bf16.mxu0 %vm1212_vm1, %v2100_v42 }
 0x21e   :  { %v1643_v60 = vadd.f32 %v3660_v59, %v4714_v7  ;;  %v1634_v61 = vpop.f32.mrb[115].mxu1  ;;  %3790 = vmatmul.mubr.msk.bf16.gmra.mrb[108].mxu0 %vm1212_vm1, %v2101_v41  ;;  %v2000_v63 = vmax.f32 %v1640_v44, 0.0 }
 0x21f   :  { %v1635_v14 = vadd.f32 %v4714_v7, %v1634_v61  ;;  %v1998_v1 = vmax.f32 %v1632_v46, 0.0 }
 0x220   :  { %v2001_v55 = vmax.f32 %v1643_v60, 0.0 }
 0x221   :  { %v1999_v2 = vmax.f32 %v1635_v14, 0.0 }
 0x222   :  { %v2103_v3 = vpack.c.bf16 %v2001_v55, %v2000_v63 }
 0x223   :  { %v2102_v4 = vpack.c.bf16 %v1999_v2, %v1998_v1  ;;  %v3663_v5 = vpop.f32.mrb[116].mxu1 }
 0x224   :  { %v1656_v6 = vadd.f32 %v3663_v5, %v4714_v7  ;;  %v1647_v8 = vpop.f32.mrb[117].mxu1 }
 0x225   :  { %v1648_v9 = vadd.f32 %v4714_v7, %v1647_v8  ;;  %v3664_v56 = vpop.f32.mrb[118].mxu1  ;;  %3793 = vmatprep.mubr.msk.bf16.mxu0 %vm1212_vm1, %v2102_v4 }
 0x226   :  { %v1659_v21 = vadd.f32 %v3664_v56, %v4714_v7  ;;  %v1650_v23 = vpop.f32.mrb[119].mxu1  ;;  %3794 = vmatmul.mubr.msk.bf16.gmra.mrb[112].mxu0 %vm1212_vm1, %v2103_v3  ;;  %v2004_v49 = vmax.f32 %v1656_v6, 0.0 }
 0x227   :  { %v1651_v48 = vadd.f32 %v4714_v7, %v1650_v23  ;;  %v2002_v51 = vmax.f32 %v1648_v9, 0.0 }
 0x228   :  { %v2005_v11 = vmax.f32 %v1659_v21, 0.0 }
 0x229   :  { %v2003_v17 = vmax.f32 %v1651_v48, 0.0 }
 0x22a   :  { %v2105_v19 = vpack.c.bf16 %v2005_v11, %v2004_v49 }
 0x22b   :  { %v2104_v47 = vpack.c.bf16 %v2003_v17, %v2002_v51  ;;  %v3667_v50 = vpop.f32.mrb[120].mxu1 }
 0x22c   :  { %v1672_v16 = vadd.f32 %v3667_v50, %v4714_v7  ;;  %v1663_v20 = vpop.f32.mrb[121].mxu1 }
 0x22d   :  { %v1664_v52 = vadd.f32 %v4714_v7, %v1663_v20  ;;  %v3668_v54 = vpop.f32.mrb[122].mxu1  ;;  %3797 = vmatprep.mubr.msk.bf16.mxu0 %vm1212_vm1, %v2104_v47 }
 0x22e   :  { %v1675_v26 = vadd.f32 %v3668_v54, %v4714_v7  ;;  %v1666_v28 = vpop.f32.mrb[123].mxu1  ;;  %3798 = vmatmul.mubr.msk.bf16.gmra.mrb[116].mxu0 %vm1212_vm1, %v2105_v19  ;;  %v2008_v62 = vmax.f32 %v1672_v16, 0.0 }
 0x22f   :  { %v1667_v58 = vadd.f32 %v4714_v7, %v1666_v28  ;;  %v2006_v35 = vmax.f32 %v1664_v52, 0.0 }
 0x230   :  { %v2009_v0 = vmax.f32 %v1675_v26, 0.0 }
 0x231   :  { %v2007_v37 = vmax.f32 %v1667_v58, 0.0 }
 0x232   :  { %v2107_v10 = vpack.c.bf16 %v2009_v0, %v2008_v62 }
 0x233   :  { %v2106_v12 = vpack.c.bf16 %v2007_v37, %v2006_v35  ;;  %v3671_v53 = vpop.f32.mrb[124].mxu1 }
 0x234   :  { %v1688_v57 = vadd.f32 %v3671_v53, %v4714_v7  ;;  %v1679_v36 = vpop.f32.mrb[125].mxu1 }
 0x235   :  { %v1680_v13 = vadd.f32 %v4714_v7, %v1679_v36  ;;  %v3672_v15 = vpop.f32.mrb[126].mxu1  ;;  %3801 = vmatprep.mubr.msk.bf16.mxu0 %vm1212_vm1, %v2106_v12 }
 0x236   :  { %v1691_v22 = vadd.f32 %v3672_v15, %v4714_v7  ;;  %v1682_v24 = vpop.f32.mrb[127].mxu1  ;;  %3802 = vmatmul.mubr.msk.bf16.gmra.mrb[120].mxu0 %vm1212_vm1, %v2107_v10  ;;  %v2012_v27 = vmax.f32 %v1688_v57, 0.0 }
 0x237   :  { %v1683_v25 = vadd.f32 %v4714_v7, %v1682_v24  ;;  %v2010_v30 = vmax.f32 %v1680_v13, 0.0 }
 0x238   :  { %v2013_v29 = vmax.f32 %v1691_v22, 0.0 }
 0x239   :  { %v2011_v31 = vmax.f32 %v1683_v25, 0.0 }
 0x23a   :  { %v2109_v32 = vpack.c.bf16 %v2013_v29, %v2012_v27 }
 0x23b   :  { %v2108_v34 = vpack.c.bf16 %v2011_v31, %v2010_v30  ;;  %v3675_v33 = vpop.f32.mrb[128].mxu1 }
 0x23c   :  { %v1704_v38 = vadd.f32 %v3675_v33, %v4714_v7  ;;  %v1695_v18 = vpop.f32.mrb[129].mxu1 }
 0x23d   :  { %v1696_v39 = vadd.f32 %v4714_v7, %v1695_v18  ;;  %v3676_v40 = vpop.f32.mrb[130].mxu1  ;;  %3805 = vmatprep.mubr.msk.bf16.mxu0 %vm1212_vm1, %v2108_v34 }
 0x23e   :  { %v1707_v41 = vadd.f32 %v3676_v40, %v4714_v7  ;;  %v1698_v42 = vpop.f32.mrb[131].mxu1  ;;  %3806 = vmatmul.mubr.msk.bf16.gmra.mrb[124].mxu0 %vm1212_vm1, %v2109_v32  ;;  %v2016_v44 = vmax.f32 %v1704_v38, 0.0 }
 0x23f   :  { %v1699_v43 = vadd.f32 %v4714_v7, %v1698_v42  ;;  %v2014_v46 = vmax.f32 %v1696_v39, 0.0 }
 0x240   :  { %v2017_v45 = vmax.f32 %v1707_v41, 0.0 }
 0x241   :  { %v2015_v59 = vmax.f32 %v1699_v43, 0.0 }
 0x242   :  { %v2111_v60 = vpack.c.bf16 %v2017_v45, %v2016_v44 }
 0x243   :  { %v2110_v61 = vpack.c.bf16 %v2015_v59, %v2014_v46  ;;  %v3679_v14 = vpop.f32.mrb[132].mxu1 }
 0x244   :  { %v1720_v63 = vadd.f32 %v3679_v14, %v4714_v7  ;;  %v1711_v55 = vpop.f32.mrb[133].mxu1 }
 0x245   :  { %v1712_v1 = vadd.f32 %v4714_v7, %v1711_v55  ;;  %v3680_v2 = vpop.f32.mrb[134].mxu1  ;;  %3809 = vmatprep.mubr.msk.bf16.mxu0 %vm1212_vm1, %v2110_v61 }
 0x246   :  { %v1723_v3 = vadd.f32 %v3680_v2, %v4714_v7  ;;  %v1714_v4 = vpop.f32.mrb[135].mxu1  ;;  %3810 = vmatmul.mubr.msk.bf16.gmra.mrb[128].mxu0 %vm1212_vm1, %v2111_v60  ;;  %v2020_v6 = vmax.f32 %v1720_v63, 0.0 }
 0x247   :  { %v1715_v5 = vadd.f32 %v4714_v7, %v1714_v4  ;;  %v2018_v9 = vmax.f32 %v1712_v1, 0.0 }
 0x248   :  { %v2021_v8 = vmax.f32 %v1723_v3, 0.0 }
 0x249   :  { %v2019_v56 = vmax.f32 %v1715_v5, 0.0 }
 0x24a   :  { %v2113_v21 = vpack.c.bf16 %v2021_v8, %v2020_v6 }
 0x24b   :  { %v2112_v23 = vpack.c.bf16 %v2019_v56, %v2018_v9  ;;  %v3683_v48 = vpop.f32.mrb[136].mxu1 }
 0x24c   :  { %v1736_v49 = vadd.f32 %v3683_v48, %v4714_v7  ;;  %v1727_v11 = vpop.f32.mrb[137].mxu1 }
 0x24d   :  { %v1728_v51 = vadd.f32 %v4714_v7, %v1727_v11  ;;  %v3684_v17 = vpop.f32.mrb[138].mxu1  ;;  %3813 = vmatprep.mubr.msk.bf16.mxu0 %vm1212_vm1, %v2112_v23 }
 0x24e   :  { %v1739_v19 = vadd.f32 %v3684_v17, %v4714_v7  ;;  %v1730_v47 = vpop.f32.mrb[139].mxu1  ;;  %3814 = vmatmul.mubr.msk.bf16.gmra.mrb[132].mxu0 %vm1212_vm1, %v2113_v21  ;;  %v2024_v16 = vmax.f32 %v1736_v49, 0.0 }
 0x24f   :  { %v1731_v50 = vadd.f32 %v4714_v7, %v1730_v47  ;;  %v2022_v52 = vmax.f32 %v1728_v51, 0.0 }
 0x250   :  { %v2025_v20 = vmax.f32 %v1739_v19, 0.0 }
 0x251   :  { %v2023_v54 = vmax.f32 %v1731_v50, 0.0 }
 0x252   :  { %v2115_v26 = vpack.c.bf16 %v2025_v20, %v2024_v16 }
 0x253   :  { %v2114_v28 = vpack.c.bf16 %v2023_v54, %v2022_v52  ;;  %v3687_v58 = vpop.f32.mrb[140].mxu1 }
 0x254   :  { %v1752_v62 = vadd.f32 %v3687_v58, %v4714_v7  ;;  %v1743_v0 = vpop.f32.mrb[141].mxu1 }
 0x255   :  { %v1744_v35 = vadd.f32 %v4714_v7, %v1743_v0  ;;  %v3688_v37 = vpop.f32.mrb[142].mxu1  ;;  %3817 = vmatprep.mubr.msk.bf16.mxu0 %vm1212_vm1, %v2114_v28 }
 0x256   :  { %v1755_v10 = vadd.f32 %v3688_v37, %v4714_v7  ;;  %v1746_v12 = vpop.f32.mrb[143].mxu1  ;;  %3818 = vmatmul.mubr.msk.bf16.gmra.mrb[136].mxu0 %vm1212_vm1, %v2115_v26  ;;  %v2028_v57 = vmax.f32 %v1752_v62, 0.0 }
 0x257   :  { %v1747_v53 = vadd.f32 %v4714_v7, %v1746_v12  ;;  %v2026_v13 = vmax.f32 %v1744_v35, 0.0 }
 0x258   :  { %v2029_v36 = vmax.f32 %v1755_v10, 0.0 }
 0x259   :  { %v2027_v15 = vmax.f32 %v1747_v53, 0.0 }
 0x25a   :  { %v2117_v22 = vpack.c.bf16 %v2029_v36, %v2028_v57 }
 0x25b   :  { %v2116_v24 = vpack.c.bf16 %v2027_v15, %v2026_v13  ;;  %v3691_v25 = vpop.f32.mrb[144].mxu1 }
 0x25c   :  { %v1768_v27 = vadd.f32 %v3691_v25, %v4714_v7  ;;  %v1759_v29 = vpop.f32.mrb[145].mxu1 }
 0x25d   :  { %v1760_v30 = vadd.f32 %v4714_v7, %v1759_v29  ;;  %v3692_v31 = vpop.f32.mrb[146].mxu1  ;;  %3821 = vmatprep.mubr.msk.bf16.mxu0 %vm1212_vm1, %v2116_v24 }
 0x25e   :  { %v1771_v32 = vadd.f32 %v3692_v31, %v4714_v7  ;;  %v1762_v34 = vpop.f32.mrb[147].mxu1  ;;  %3822 = vmatmul.mubr.msk.bf16.gmra.mrb[140].mxu0 %vm1212_vm1, %v2117_v22  ;;  %v2032_v38 = vmax.f32 %v1768_v27, 0.0 }
 0x25f   :  { %v1763_v33 = vadd.f32 %v4714_v7, %v1762_v34  ;;  %v2030_v39 = vmax.f32 %v1760_v30, 0.0 }
 0x260   :  { %v2033_v18 = vmax.f32 %v1771_v32, 0.0 }
 0x261   :  { %v2031_v40 = vmax.f32 %v1763_v33, 0.0 }
 0x262   :  { %v2119_v41 = vpack.c.bf16 %v2033_v18, %v2032_v38 }
 0x263   :  { %v2118_v42 = vpack.c.bf16 %v2031_v40, %v2030_v39  ;;  %v3695_v43 = vpop.f32.mrb[148].mxu1 }
 0x264   :  { %v1784_v44 = vadd.f32 %v3695_v43, %v4714_v7  ;;  %v1775_v45 = vpop.f32.mrb[149].mxu1 }
 0x265   :  { %v1776_v46 = vadd.f32 %v4714_v7, %v1775_v45  ;;  %v3696_v59 = vpop.f32.mrb[150].mxu1  ;;  %3825 = vmatprep.mubr.msk.bf16.mxu0 %vm1212_vm1, %v2118_v42 }
 0x266   :  { %v1787_v60 = vadd.f32 %v3696_v59, %v4714_v7  ;;  %v1778_v61 = vpop.f32.mrb[151].mxu1  ;;  %3826 = vmatmul.mubr.msk.bf16.gmra.mrb[144].mxu0 %vm1212_vm1, %v2119_v41  ;;  %v2036_v63 = vmax.f32 %v1784_v44, 0.0 }
 0x267   :  { %v1779_v14 = vadd.f32 %v4714_v7, %v1778_v61  ;;  %v2034_v1 = vmax.f32 %v1776_v46, 0.0 }
 0x268   :  { %v2037_v55 = vmax.f32 %v1787_v60, 0.0 }
 0x269   :  { %v2035_v2 = vmax.f32 %v1779_v14, 0.0 }
 0x26a   :  { %v2121_v3 = vpack.c.bf16 %v2037_v55, %v2036_v63 }
 0x26b   :  { %v2120_v4 = vpack.c.bf16 %v2035_v2, %v2034_v1  ;;  %v3699_v5 = vpop.f32.mrb[152].mxu1 }
 0x26c   :  { %v1800_v6 = vadd.f32 %v3699_v5, %v4714_v7  ;;  %v1791_v8 = vpop.f32.mrb[153].mxu1 }
 0x26d   :  { %v1792_v9 = vadd.f32 %v4714_v7, %v1791_v8  ;;  %v3700_v56 = vpop.f32.mrb[154].mxu1  ;;  %3829 = vmatprep.mubr.msk.bf16.mxu0 %vm1212_vm1, %v2120_v4 }
 0x26e   :  { %v1803_v21 = vadd.f32 %v3700_v56, %v4714_v7  ;;  %v1794_v23 = vpop.f32.mrb[155].mxu1  ;;  %3830 = vmatmul.mubr.msk.bf16.gmra.mrb[148].mxu0 %vm1212_vm1, %v2121_v3  ;;  %v2040_v49 = vmax.f32 %v1800_v6, 0.0 }
 0x26f   :  { %v1795_v48 = vadd.f32 %v4714_v7, %v1794_v23  ;;  %v2038_v51 = vmax.f32 %v1792_v9, 0.0 }
 0x270   :  { %v2041_v11 = vmax.f32 %v1803_v21, 0.0 }
 0x271   :  { %v2039_v17 = vmax.f32 %v1795_v48, 0.0 }
 0x272   :  { %v2123_v19 = vpack.c.bf16 %v2041_v11, %v2040_v49 }
 0x273   :  { %v2122_v47 = vpack.c.bf16 %v2039_v17, %v2038_v51  ;;  %v3703_v50 = vpop.f32.mrb[156].mxu1 }
 0x274   :  { %v1816_v16 = vadd.f32 %v3703_v50, %v4714_v7  ;;  %v1807_v20 = vpop.f32.mrb[157].mxu1 }
 0x275   :  { %v1808_v52 = vadd.f32 %v4714_v7, %v1807_v20  ;;  %v3704_v54 = vpop.f32.mrb[158].mxu1  ;;  %3833 = vmatprep.mubr.msk.bf16.mxu0 %vm1212_vm1, %v2122_v47 }
 0x276   :  { %v1819_v26 = vadd.f32 %v3704_v54, %v4714_v7  ;;  %v1810_v28 = vpop.f32.mrb[159].mxu1  ;;  %3834 = vmatmul.mubr.msk.bf16.gmra.mrb[152].mxu0 %vm1212_vm1, %v2123_v19  ;;  %v2044_v62 = vmax.f32 %v1816_v16, 0.0  ;;  %v4903_v16 = vld [vmem:[%s5072_s6] ss:$0 sm:$0xff] }
 0x277   :  { %v1811_v58 = vadd.f32 %v4714_v7, %v1810_v28  ;;  %v2042_v35 = vmax.f32 %v1808_v52, 0.0 }
 0x278   :  { %v2045_v0 = vmax.f32 %v1819_v26, 0.0 }
 0x279   :  { %v2043_v37 = vmax.f32 %v1811_v58, 0.0 }
 0x27a   :  { %v2125_v10 = vpack.c.bf16 %v2045_v0, %v2044_v62 }
 0x27b   :  { %v2124_v12 = vpack.c.bf16 %v2043_v37, %v2042_v35  ;;  %v3707_v53 = vpop.f32.mrb[160].mxu1 }
 0x27c   :  { %v1832_v57 = vadd.f32 %v3707_v53, %v4714_v7  ;;  %v1823_v36 = vpop.f32.mrb[161].mxu1 }
 0x27d   :  { %v1824_v13 = vadd.f32 %v4714_v7, %v1823_v36  ;;  %v3708_v15 = vpop.f32.mrb[162].mxu1  ;;  %3837 = vmatprep.mubr.msk.bf16.mxu0 %vm1212_vm1, %v2124_v12 }
 0x27e   :  { %v1835_v22 = vadd.f32 %v3708_v15, %v4714_v7  ;;  %v1826_v24 = vpop.f32.mrb[163].mxu1  ;;  %3838 = vmatmul.mubr.msk.bf16.gmra.mrb[156].mxu0 %vm1212_vm1, %v2125_v10  ;;  %v2048_v27 = vmax.f32 %v1832_v57, 0.0 }
 0x27f   :  { %v1827_v25 = vadd.f32 %v4714_v7, %v1826_v24  ;;  %v2046_v30 = vmax.f32 %v1824_v13, 0.0 }
 0x280   :  { %v2049_v29 = vmax.f32 %v1835_v22, 0.0 }
 0x281   :  { %v2047_v31 = vmax.f32 %v1827_v25, 0.0 }
 0x282   :  { %v2127_v32 = vpack.c.bf16 %v2049_v29, %v2048_v27 }
 0x283   :  { %v2126_v34 = vpack.c.bf16 %v2047_v31, %v2046_v30  ;;  %v3711_v33 = vpop.f32.mrb[164].mxu1 }
 0x284   :  { %v1848_v38 = vadd.f32 %v3711_v33, %v4714_v7  ;;  %v1839_v18 = vpop.f32.mrb[165].mxu1 }
 0x285   :  { %v1840_v39 = vadd.f32 %v4714_v7, %v1839_v18  ;;  %v3712_v40 = vpop.f32.mrb[166].mxu1  ;;  %3841 = vmatprep.mubr.msk.bf16.mxu0 %vm1212_vm1, %v2126_v34 }
 0x286   :  { %v1851_v41 = vadd.f32 %v3712_v40, %v4714_v7  ;;  %v1842_v42 = vpop.f32.mrb[167].mxu1  ;;  %3842 = vmatmul.mubr.msk.bf16.gmra.mrb[160].mxu0 %vm1212_vm1, %v2127_v32  ;;  %v2052_v44 = vmax.f32 %v1848_v38, 0.0 }
 0x287   :  { %v1843_v43 = vadd.f32 %v4714_v7, %v1842_v42  ;;  %v2050_v46 = vmax.f32 %v1840_v39, 0.0 }
 0x288   :  { %v2053_v45 = vmax.f32 %v1851_v41, 0.0 }
 0x289   :  { %v2051_v59 = vmax.f32 %v1843_v43, 0.0 }
 0x28a   :  { %v2129_v60 = vpack.c.bf16 %v2053_v45, %v2052_v44 }
 0x28b   :  { %v2128_v61 = vpack.c.bf16 %v2051_v59, %v2050_v46  ;;  %v3715_v14 = vpop.f32.mrb[168].mxu1 }
 0x28c   :  { %v1864_v63 = vadd.f32 %v3715_v14, %v4714_v7  ;;  %v1855_v55 = vpop.f32.mrb[169].mxu1 }
 0x28d   :  { %v1856_v1 = vadd.f32 %v4714_v7, %v1855_v55  ;;  %v3716_v2 = vpop.f32.mrb[170].mxu1  ;;  %3845 = vmatprep.mubr.msk.bf16.mxu0 %vm1212_vm1, %v2128_v61 }
 0x28e   :  { %v1867_v3 = vadd.f32 %v3716_v2, %v4714_v7  ;;  %v1858_v4 = vpop.f32.mrb[171].mxu1  ;;  %3846 = vmatmul.mubr.msk.bf16.gmra.mrb[164].mxu0 %vm1212_vm1, %v2129_v60  ;;  %v2056_v6 = vmax.f32 %v1864_v63, 0.0 }
 0x28f   :  { %v1859_v5 = vadd.f32 %v4714_v7, %v1858_v4  ;;  %v2054_v9 = vmax.f32 %v1856_v1, 0.0 }
 0x290   :  { %v2057_v8 = vmax.f32 %v1867_v3, 0.0 }
 0x291   :  { %v2055_v56 = vmax.f32 %v1859_v5, 0.0 }
 0x292   :  { %v2131_v21 = vpack.c.bf16 %v2057_v8, %v2056_v6 }
 0x293   :  { %v2130_v23 = vpack.c.bf16 %v2055_v56, %v2054_v9  ;;  %v3719_v48 = vpop.f32.mrb[172].mxu1 }
 0x294   :  { %v1880_v49 = vadd.f32 %v3719_v48, %v4714_v7  ;;  %v1871_v11 = vpop.f32.mrb[173].mxu1 }
 0x295   :  { %v1872_v51 = vadd.f32 %v4714_v7, %v1871_v11  ;;  %v3720_v17 = vpop.f32.mrb[174].mxu1  ;;  %3849 = vmatprep.mubr.msk.bf16.mxu0 %vm1212_vm1, %v2130_v23  ;;  %v3890_v11 = vld [vmem:[%s5070_s4] ss:$0 sm:$0xff]  ;;  %s3915_s4 = smov [#allocation2]  }
 0x296   :  { %v1883_v19 = vadd.f32 %v3720_v17, %v4714_v7  ;;  %v1874_v47 = vpop.f32.mrb[175].mxu1  ;;  %3850 = vmatmul.mubr.msk.bf16.gmra.mrb[168].mxu0 %vm1212_vm1, %v2131_v21  ;;  %v2060_v20 = vmax.f32 %v1880_v49, 0.0  ;;  %s3051_s10 = sshll.u32 %s3915_s4, 4  ;;  %s3052_s10 = int_to_ptr.vmem [resolvable:$true] %s3051_s10 }
 0x297   :  { %v1875_v50 = vadd.f32 %v4714_v7, %v1874_v47  ;;  %v2058_v54 = vmax.f32 %v1872_v51, 0.0  ;;  %s3891_s3 = scalar_lea.vmem %s3052_s10, 16384  ;;  %p3896_p1 = scmp.lt.s32.totalorder %s3052_s10, %s3052_s10 }
 0x298   :  { %v2061_v52 = vmax.f32 %v1883_v19, 0.0  ;;  %p3892_p0 = scmp.ne.s32.totalorder %s3052_s10, %s3891_s3  ;;  %p3897_p2 = scmp.lt.s32.totalorder %s3891_s3, %s3891_s3 }
 0x299   :  { %v2059_v26 = vmax.f32 %v1875_v50, 0.0  ;;  %v3747_v28 = vpop.f32.mrb[64].mxu0 }
 0x29a   :  { %v2133_v58 = vpack.c.bf16 %v2061_v52, %v2060_v20  ;;  %v2416_v62 = vadd.f32 %v3747_v28, %v4903_v16  ;;  %v2407_v0 = vpop.f32.mrb[65].mxu0  ;;  %p3898_p3 = por %p3897_p2, %p3896_p1 }
 0x29b   :  { %v2132_v35 = vpack.c.bf16 %v2059_v26, %v2058_v54  ;;  %v2408_v37 = vadd.f32 %v4903_v16, %v2407_v0  ;;  %v3723_v10 = vpop.f32.mrb[176].mxu1  ;;  %v3748_v12 = vpop.f32.mrb[66].mxu0 }
 0x29c   :  { %2920 = vst [vmem:[#allocation2 + $0x10] sm:$0xff] %v2416_v62  ;;  %v1896_v53 = vadd.f32 %v3723_v10, %v4714_v7  ;;  %v2419_v57 = vadd.f32 %v3748_v12, %v4903_v16  ;;  %v1887_v36 = vpop.f32.mrb[177].mxu1  ;;  %v2410_v13 = vpop.f32.mrb[67].mxu0  ;;  %p3899_p4 = pnand %p3898_p3, %p3892_p0 }
 0x29d   :  { %2918 = vst [vmem:[#allocation2] sm:$0xff] %v2408_v37  ;;  %v1888_v15 = vadd.f32 %v4714_v7, %v1887_v36  ;;  %v2411_v22 = vadd.f32 %v4903_v16, %v2410_v13  ;;  %v3724_v24 = vpop.f32.mrb[178].mxu1  ;;  %3853 = vmatprep.mubr.msk.bf16.mxu0 %vm1212_vm1, %v2132_v35 }
 0x29e   :  { %2921 = vst [vmem:[#allocation2 + $0x18] sm:$0xff] %v2419_v57  ;;  %v1899_v25 = vadd.f32 %v3724_v24, %v4714_v7  ;;  %v1890_v27 = vpop.f32.mrb[179].mxu1  ;;  %3854 = vmatmul.mubr.msk.bf16.gmra.mrb[172].mxu0 %vm1212_vm1, %v2133_v58  ;;  %v2064_v30 = vmax.f32 %v1896_v53, 0.0 }
 0x29f   :  { %2919 = vst [vmem:[#allocation2 + $0x8] sm:$0xff] %v2411_v22  ;;  %v1891_v29 = vadd.f32 %v4714_v7, %v1890_v27  ;;  %v2062_v32 = vmax.f32 %v1888_v15, 0.0 }
 0x2a0   :  { %v2065_v31 = vmax.f32 %v1899_v25, 0.0 }
 0x2a1   :  { %v2063_v34 = vmax.f32 %v1891_v29, 0.0  ;;  %v3751_v33 = vpop.f32.mrb[68].mxu0 }
 0x2a2   :  { %v2135_v38 = vpack.c.bf16 %v2065_v31, %v2064_v30  ;;  %v2432_v18 = vadd.f32 %v3751_v33, %v4903_v16  ;;  %v2423_v39 = vpop.f32.mrb[69].mxu0 }
 0x2a3   :  { %v2134_v40 = vpack.c.bf16 %v2063_v34, %v2062_v32  ;;  %v2424_v41 = vadd.f32 %v4903_v16, %v2423_v39  ;;  %v3727_v42 = vpop.f32.mrb[180].mxu1  ;;  %v3752_v43 = vpop.f32.mrb[70].mxu0 }
 0x2a4   :  { %2924 = vst [vmem:[#allocation2 + $0x30] sm:$0xff] %v2432_v18  ;;  %v1912_v44 = vadd.f32 %v3727_v42, %v4714_v7  ;;  %v2435_v45 = vadd.f32 %v3752_v43, %v4903_v16  ;;  %v1903_v46 = vpop.f32.mrb[181].mxu1  ;;  %v2426_v59 = vpop.f32.mrb[71].mxu0 }
 0x2a5   :  { %2922 = vst [vmem:[#allocation2 + $0x20] sm:$0xff] %v2424_v41  ;;  %v1904_v60 = vadd.f32 %v4714_v7, %v1903_v46  ;;  %v2427_v61 = vadd.f32 %v4903_v16, %v2426_v59  ;;  %v3728_v14 = vpop.f32.mrb[182].mxu1  ;;  %3857 = vmatprep.mubr.msk.bf16.mxu0 %vm1212_vm1, %v2134_v40 }
 0x2a6   :  { %2925 = vst [vmem:[#allocation2 + $0x38] sm:$0xff] %v2435_v45  ;;  %v1915_v63 = vadd.f32 %v3728_v14, %v4714_v7  ;;  %v1906_v55 = vpop.f32.mrb[183].mxu1  ;;  %3858 = vmatmul.mubr.msk.bf16.gmra.mrb[176].mxu0 %vm1212_vm1, %v2135_v38  ;;  %v2068_v2 = vmax.f32 %v1912_v44, 0.0 }
 0x2a7   :  { %2923 = vst [vmem:[#allocation2 + $0x28] sm:$0xff] %v2427_v61  ;;  %v1907_v1 = vadd.f32 %v4714_v7, %v1906_v55  ;;  %v2066_v4 = vmax.f32 %v1904_v60, 0.0 }
 0x2a8   :  { %v2069_v3 = vmax.f32 %v1915_v63, 0.0 }
 0x2a9   :  { %v2067_v5 = vmax.f32 %v1907_v1, 0.0  ;;  %v3755_v6 = vpop.f32.mrb[72].mxu0 }
 0x2aa   :  { %v2137_v8 = vpack.c.bf16 %v2069_v3, %v2068_v2  ;;  %v2448_v9 = vadd.f32 %v3755_v6, %v4903_v16  ;;  %v2439_v56 = vpop.f32.mrb[73].mxu0 }
 0x2ab   :  { %v2136_v21 = vpack.c.bf16 %v2067_v5, %v2066_v4  ;;  %v2440_v23 = vadd.f32 %v4903_v16, %v2439_v56  ;;  %v3731_v48 = vpop.f32.mrb[184].mxu1  ;;  %v3756_v49 = vpop.f32.mrb[74].mxu0 }
 0x2ac   :  { %2928 = vst [vmem:[#allocation2 + $0x50] sm:$0xff] %v2448_v9  ;;  %v1928_v7 = vadd.f32 %v3890_v11, %v3731_v48  ;;  %v2451_v51 = vadd.f32 %v3756_v49, %v4903_v16  ;;  %v1919_v17 = vpop.f32.mrb[185].mxu1  ;;  %v2442_v19 = vpop.f32.mrb[75].mxu0 }
 0x2ad   :  { %2926 = vst [vmem:[#allocation2 + $0x40] sm:$0xff] %v2440_v23  ;;  %v1920_v47 = vadd.f32 %v3890_v11, %v1919_v17  ;;  %v2443_v50 = vadd.f32 %v4903_v16, %v2442_v19  ;;  %v3732_v20 = vpop.f32.mrb[186].mxu1  ;;  %3861 = vmatprep.mubr.msk.bf16.mxu0 %vm1212_vm1, %v2136_v21 }
 0x2ae   :  { %2929 = vst [vmem:[#allocation2 + $0x58] sm:$0xff] %v2451_v51  ;;  %v1931_v52 = vadd.f32 %v3890_v11, %v3732_v20  ;;  %v1922_v54 = vpop.f32.mrb[187].mxu1  ;;  %3862 = vmatmul.mubr.msk.bf16.gmra.mrb[180].mxu0 %vm1212_vm1, %v2137_v8  ;;  %v2072_v28 = vmax.f32 %v1928_v7, 0.0 }
 0x2af   :  { %2927 = vst [vmem:[#allocation2 + $0x48] sm:$0xff] %v2443_v50  ;;  %v1923_v26 = vadd.f32 %v3890_v11, %v1922_v54  ;;  %v2070_v62 = vmax.f32 %v1920_v47, 0.0 }
 0x2b0   :  { %v2073_v58 = vmax.f32 %v1931_v52, 0.0 }
 0x2b1   :  { %v2071_v0 = vmax.f32 %v1923_v26, 0.0  ;;  %v3759_v35 = vpop.f32.mrb[76].mxu0 }
 0x2b2   :  { %v2139_v37 = vpack.c.bf16 %v2073_v58, %v2072_v28  ;;  %v2464_v10 = vadd.f32 %v3759_v35, %v4903_v16  ;;  %v2455_v12 = vpop.f32.mrb[77].mxu0 }
 0x2b3   :  { %v2138_v53 = vpack.c.bf16 %v2071_v0, %v2070_v62  ;;  %v2456_v57 = vadd.f32 %v4903_v16, %v2455_v12  ;;  %v3735_v36 = vpop.f32.mrb[188].mxu1  ;;  %v3760_v13 = vpop.f32.mrb[78].mxu0 }
 0x2b4   :  { %2932 = vst [vmem:[#allocation2 + $0x70] sm:$0xff] %v2464_v10  ;;  %v1944_v15 = vadd.f32 %v3890_v11, %v3735_v36  ;;  %v2467_v22 = vadd.f32 %v3760_v13, %v4903_v16  ;;  %v1935_v24 = vpop.f32.mrb[189].mxu1  ;;  %v2458_v25 = vpop.f32.mrb[79].mxu0 }
 0x2b5   :  { %2930 = vst [vmem:[#allocation2 + $0x60] sm:$0xff] %v2456_v57  ;;  %v1936_v27 = vadd.f32 %v3890_v11, %v1935_v24  ;;  %v2459_v29 = vadd.f32 %v4903_v16, %v2458_v25  ;;  %v3736_v30 = vpop.f32.mrb[190].mxu1  ;;  %3865 = vmatprep.mubr.msk.bf16.mxu0 %vm1212_vm1, %v2138_v53 }
 0x2b6   :  { %2933 = vst [vmem:[#allocation2 + $0x78] sm:$0xff] %v2467_v22  ;;  %v1947_v31 = vadd.f32 %v3890_v11, %v3736_v30  ;;  %v1938_v32 = vpop.f32.mrb[191].mxu1  ;;  %3866 = vmatmul.mubr.msk.bf16.gmra.mrb[184].mxu0 %vm1212_vm1, %v2139_v37  ;;  %v2076_v33 = vmax.f32 %v1944_v15, 0.0 }
 0x2b7   :  { %2931 = vst [vmem:[#allocation2 + $0x68] sm:$0xff] %v2459_v29  ;;  %v1939_v34 = vadd.f32 %v3890_v11, %v1938_v32  ;;  %v2074_v18 = vmax.f32 %v1936_v27, 0.0 }
 0x2b8   :  { %v2077_v38 = vmax.f32 %v1947_v31, 0.0 }
 0x2b9   :  { %v2075_v39 = vmax.f32 %v1939_v34, 0.0  ;;  %v3763_v40 = vpop.f32.mrb[80].mxu0 }
 0x2ba   :  { %v2141_v41 = vpack.c.bf16 %v2077_v38, %v2076_v33  ;;  %v2480_v42 = vadd.f32 %v3763_v40, %v4903_v16  ;;  %v2471_v43 = vpop.f32.mrb[81].mxu0 }
 0x2bb   :  { %v2140_v44 = vpack.c.bf16 %v2075_v39, %v2074_v18  ;;  %v2472_v45 = vadd.f32 %v4903_v16, %v2471_v43  ;;  %v3764_v46 = vpop.f32.mrb[82].mxu0 }
 0x2bc   :  { %2936 = vst [vmem:[#allocation2 + $0x90] sm:$0xff] %v2480_v42  ;;  %v2483_v59 = vadd.f32 %v3764_v46, %v4903_v16  ;;  %v2474_v60 = vpop.f32.mrb[83].mxu0 }
 0x2bd   :  { %2934 = vst [vmem:[#allocation2 + $0x80] sm:$0xff] %v2472_v45  ;;  %v2475_v61 = vadd.f32 %v4903_v16, %v2474_v60  ;;  %3869 = vmatprep.mubr.msk.bf16.mxu0 %vm1212_vm1, %v2140_v44 }
 0x2be   :  { %2937 = vst [vmem:[#allocation2 + $0x98] sm:$0xff] %v2483_v59  ;;  %3870 = vmatmul.mubr.msk.bf16.gmra.mrb[188].mxu0 %vm1212_vm1, %v2141_v41 }
 0x2bf   :  { %2935 = vst [vmem:[#allocation2 + $0x88] sm:$0xff] %v2475_v61 }
 0x2c1   :  { %v3767_v14 = vpop.f32.mrb[84].mxu0 }
 0x2c2   :  { %v2496_v63 = vadd.f32 %v3767_v14, %v4903_v16  ;;  %v2487_v55 = vpop.f32.mrb[85].mxu0 }
 0x2c3   :  { %v2488_v1 = vadd.f32 %v4903_v16, %v2487_v55  ;;  %v3768_v2 = vpop.f32.mrb[86].mxu0 }
 0x2c4   :  { %2940 = vst [vmem:[#allocation2 + $0xb0] sm:$0xff] %v2496_v63  ;;  %v2499_v3 = vadd.f32 %v3768_v2, %v4903_v16  ;;  %v2490_v4 = vpop.f32.mrb[87].mxu0 }
 0x2c5   :  { %2938 = vst [vmem:[#allocation2 + $0xa0] sm:$0xff] %v2488_v1  ;;  %v2491_v5 = vadd.f32 %v4903_v16, %v2490_v4 }
 0x2c6   :  { %2941 = vst [vmem:[#allocation2 + $0xb8] sm:$0xff] %v2499_v3 }
 0x2c7   :  { %2939 = vst [vmem:[#allocation2 + $0xa8] sm:$0xff] %v2491_v5 }
 0x2c9   :  { %v3771_v6 = vpop.f32.mrb[88].mxu0 }
 0x2ca   :  { %v2512_v8 = vadd.f32 %v3771_v6, %v4903_v16  ;;  %v2503_v9 = vpop.f32.mrb[89].mxu0 }
 0x2cb   :  { %v2504_v56 = vadd.f32 %v4903_v16, %v2503_v9  ;;  %v3772_v21 = vpop.f32.mrb[90].mxu0 }
 0x2cc   :  { %2944 = vst [vmem:[#allocation2 + $0xd0] sm:$0xff] %v2512_v8  ;;  %v2515_v23 = vadd.f32 %v3772_v21, %v4903_v16  ;;  %v2506_v48 = vpop.f32.mrb[91].mxu0 }
 0x2cd   :  { %2942 = vst [vmem:[#allocation2 + $0xc0] sm:$0xff] %v2504_v56  ;;  %v2507_v49 = vadd.f32 %v4903_v16, %v2506_v48 }
 0x2ce   :  { %2945 = vst [vmem:[#allocation2 + $0xd8] sm:$0xff] %v2515_v23 }
 0x2cf   :  { %2943 = vst [vmem:[#allocation2 + $0xc8] sm:$0xff] %v2507_v49 }
 0x2d1   :  { %v3775_v11 = vpop.f32.mrb[92].mxu0 }
 0x2d2   :  { %v2528_v7 = vadd.f32 %v3775_v11, %v4903_v16  ;;  %v2519_v51 = vpop.f32.mrb[93].mxu0 }
 0x2d3   :  { %v2520_v17 = vadd.f32 %v4903_v16, %v2519_v51  ;;  %v3776_v19 = vpop.f32.mrb[94].mxu0 }
 0x2d4   :  { %2948 = vst [vmem:[#allocation2 + $0xf0] sm:$0xff] %v2528_v7  ;;  %v2531_v47 = vadd.f32 %v3776_v19, %v4903_v16  ;;  %v2522_v50 = vpop.f32.mrb[95].mxu0 }
 0x2d5   :  { %2946 = vst [vmem:[#allocation2 + $0xe0] sm:$0xff] %v2520_v17  ;;  %v2523_v20 = vadd.f32 %v4903_v16, %v2522_v50 }
 0x2d6   :  { %2949 = vst [vmem:[#allocation2 + $0xf8] sm:$0xff] %v2531_v47 }
 0x2d7   :  { %2947 = vst [vmem:[#allocation2 + $0xe8] sm:$0xff] %v2523_v20 }
 0x2d9   :  { %v3779_v52 = vpop.f32.mrb[96].mxu0 }
 0x2da   :  { %v2544_v54 = vadd.f32 %v3779_v52, %v4903_v16  ;;  %v2535_v26 = vpop.f32.mrb[97].mxu0 }
 0x2db   :  { %v2536_v28 = vadd.f32 %v4903_v16, %v2535_v26  ;;  %v3780_v58 = vpop.f32.mrb[98].mxu0 }
 0x2dc   :  { %2952 = vst [vmem:[#allocation2 + $0x110] sm:$0xff] %v2544_v54  ;;  %v2547_v62 = vadd.f32 %v3780_v58, %v4903_v16  ;;  %v2538_v0 = vpop.f32.mrb[99].mxu0 }
 0x2dd   :  { %2950 = vst [vmem:[#allocation2 + $0x100] sm:$0xff] %v2536_v28  ;;  %v2539_v35 = vadd.f32 %v4903_v16, %v2538_v0 }
 0x2de   :  { %2953 = vst [vmem:[#allocation2 + $0x118] sm:$0xff] %v2547_v62 }
 0x2df   :  { %2951 = vst [vmem:[#allocation2 + $0x108] sm:$0xff] %v2539_v35 }
 0x2e1   :  { %v3783_v37 = vpop.f32.mrb[100].mxu0 }
 0x2e2   :  { %v2560_v10 = vadd.f32 %v3783_v37, %v4903_v16  ;;  %v2551_v12 = vpop.f32.mrb[101].mxu0 }
 0x2e3   :  { %v2552_v53 = vadd.f32 %v4903_v16, %v2551_v12  ;;  %v3784_v57 = vpop.f32.mrb[102].mxu0 }
 0x2e4   :  { %2956 = vst [vmem:[#allocation2 + $0x130] sm:$0xff] %v2560_v10  ;;  %v2563_v36 = vadd.f32 %v3784_v57, %v4903_v16  ;;  %v2554_v13 = vpop.f32.mrb[103].mxu0 }
 0x2e5   :  { %2954 = vst [vmem:[#allocation2 + $0x120] sm:$0xff] %v2552_v53  ;;  %v2555_v15 = vadd.f32 %v4903_v16, %v2554_v13 }
 0x2e6   :  { %2957 = vst [vmem:[#allocation2 + $0x138] sm:$0xff] %v2563_v36 }
 0x2e7   :  { %2955 = vst [vmem:[#allocation2 + $0x128] sm:$0xff] %v2555_v15 }
 0x2e9   :  { %v3787_v22 = vpop.f32.mrb[104].mxu0 }
 0x2ea   :  { %v2576_v24 = vadd.f32 %v3787_v22, %v4903_v16  ;;  %v2567_v25 = vpop.f32.mrb[105].mxu0 }
 0x2eb   :  { %v2568_v27 = vadd.f32 %v4903_v16, %v2567_v25  ;;  %v3788_v29 = vpop.f32.mrb[106].mxu0 }
 0x2ec   :  { %2960 = vst [vmem:[#allocation2 + $0x150] sm:$0xff] %v2576_v24  ;;  %v2579_v30 = vadd.f32 %v3788_v29, %v4903_v16  ;;  %v2570_v31 = vpop.f32.mrb[107].mxu0 }
 0x2ed   :  { %2958 = vst [vmem:[#allocation2 + $0x140] sm:$0xff] %v2568_v27  ;;  %v2571_v32 = vadd.f32 %v4903_v16, %v2570_v31 }
 0x2ee   :  { %2961 = vst [vmem:[#allocation2 + $0x158] sm:$0xff] %v2579_v30 }
 0x2ef   :  { %2959 = vst [vmem:[#allocation2 + $0x148] sm:$0xff] %v2571_v32 }
 0x2f1   :  { %v3791_v34 = vpop.f32.mrb[108].mxu0 }
 0x2f2   :  { %v2592_v33 = vadd.f32 %v3791_v34, %v4903_v16  ;;  %v2583_v38 = vpop.f32.mrb[109].mxu0 }
 0x2f3   :  { %v2584_v18 = vadd.f32 %v4903_v16, %v2583_v38  ;;  %v3792_v39 = vpop.f32.mrb[110].mxu0 }
 0x2f4   :  { %2964 = vst [vmem:[#allocation2 + $0x170] sm:$0xff] %v2592_v33  ;;  %v2595_v40 = vadd.f32 %v3792_v39, %v4903_v16  ;;  %v2586_v41 = vpop.f32.mrb[111].mxu0 }
 0x2f5   :  { %2962 = vst [vmem:[#allocation2 + $0x160] sm:$0xff] %v2584_v18  ;;  %v2587_v42 = vadd.f32 %v4903_v16, %v2586_v41 }
 0x2f6   :  { %2965 = vst [vmem:[#allocation2 + $0x178] sm:$0xff] %v2595_v40 }
 0x2f7   :  { %2963 = vst [vmem:[#allocation2 + $0x168] sm:$0xff] %v2587_v42 }
 0x2f9   :  { %v3795_v43 = vpop.f32.mrb[112].mxu0 }
 0x2fa   :  { %v2608_v44 = vadd.f32 %v3795_v43, %v4903_v16  ;;  %v2599_v45 = vpop.f32.mrb[113].mxu0 }
 0x2fb   :  { %v2600_v46 = vadd.f32 %v4903_v16, %v2599_v45  ;;  %v3796_v59 = vpop.f32.mrb[114].mxu0 }
 0x2fc   :  { %2968 = vst [vmem:[#allocation2 + $0x190] sm:$0xff] %v2608_v44  ;;  %v2611_v60 = vadd.f32 %v3796_v59, %v4903_v16  ;;  %v2602_v61 = vpop.f32.mrb[115].mxu0 }
 0x2fd   :  { %2966 = vst [vmem:[#allocation2 + $0x180] sm:$0xff] %v2600_v46  ;;  %v2603_v14 = vadd.f32 %v4903_v16, %v2602_v61 }
 0x2fe   :  { %2969 = vst [vmem:[#allocation2 + $0x198] sm:$0xff] %v2611_v60 }
 0x2ff   :  { %2967 = vst [vmem:[#allocation2 + $0x188] sm:$0xff] %v2603_v14 }
 0x301   :  { %v3799_v63 = vpop.f32.mrb[116].mxu0 }
 0x302   :  { %v2624_v55 = vadd.f32 %v3799_v63, %v4903_v16  ;;  %v2615_v1 = vpop.f32.mrb[117].mxu0 }
 0x303   :  { %v2616_v2 = vadd.f32 %v4903_v16, %v2615_v1  ;;  %v3800_v3 = vpop.f32.mrb[118].mxu0 }
 0x304   :  { %2972 = vst [vmem:[#allocation2 + $0x1b0] sm:$0xff] %v2624_v55  ;;  %v2627_v4 = vadd.f32 %v3800_v3, %v4903_v16  ;;  %v2618_v5 = vpop.f32.mrb[119].mxu0 }
 0x305   :  { %2970 = vst [vmem:[#allocation2 + $0x1a0] sm:$0xff] %v2616_v2  ;;  %v2619_v6 = vadd.f32 %v4903_v16, %v2618_v5 }
 0x306   :  { %2973 = vst [vmem:[#allocation2 + $0x1b8] sm:$0xff] %v2627_v4 }
 0x307   :  { %2971 = vst [vmem:[#allocation2 + $0x1a8] sm:$0xff] %v2619_v6 }
 0x309   :  { %v3803_v8 = vpop.f32.mrb[120].mxu0 }
 0x30a   :  { %v2640_v9 = vadd.f32 %v3803_v8, %v4903_v16  ;;  %v2631_v56 = vpop.f32.mrb[121].mxu0 }
 0x30b   :  { %v2632_v21 = vadd.f32 %v4903_v16, %v2631_v56  ;;  %v3804_v23 = vpop.f32.mrb[122].mxu0 }
 0x30c   :  { %2976 = vst [vmem:[#allocation2 + $0x1d0] sm:$0xff] %v2640_v9  ;;  %v2643_v48 = vadd.f32 %v3804_v23, %v4903_v16  ;;  %v2634_v49 = vpop.f32.mrb[123].mxu0 }
 0x30d   :  { %2974 = vst [vmem:[#allocation2 + $0x1c0] sm:$0xff] %v2632_v21  ;;  %v2635_v11 = vadd.f32 %v4903_v16, %v2634_v49 }
 0x30e   :  { %2977 = vst [vmem:[#allocation2 + $0x1d8] sm:$0xff] %v2643_v48 }
 0x30f   :  { %2975 = vst [vmem:[#allocation2 + $0x1c8] sm:$0xff] %v2635_v11 }
 0x311   :  { %v3807_v7 = vpop.f32.mrb[124].mxu0 }
 0x312   :  { %v2656_v51 = vadd.f32 %v3807_v7, %v4903_v16  ;;  %v2647_v17 = vpop.f32.mrb[125].mxu0 }
 0x313   :  { %v2648_v19 = vadd.f32 %v4903_v16, %v2647_v17  ;;  %v3808_v47 = vpop.f32.mrb[126].mxu0 }
 0x314   :  { %2980 = vst [vmem:[#allocation2 + $0x1f0] sm:$0xff] %v2656_v51  ;;  %v2659_v50 = vadd.f32 %v3808_v47, %v4903_v16  ;;  %v2650_v20 = vpop.f32.mrb[127].mxu0 }
 0x315   :  { %2978 = vst [vmem:[#allocation2 + $0x1e0] sm:$0xff] %v2648_v19  ;;  %v2651_v52 = vadd.f32 %v4903_v16, %v2650_v20 }
 0x316   :  { %2981 = vst [vmem:[#allocation2 + $0x1f8] sm:$0xff] %v2659_v50 }
 0x317   :  { %2979 = vst [vmem:[#allocation2 + $0x1e8] sm:$0xff] %v2651_v52 }
 0x319   :  { %v3811_v54 = vpop.f32.mrb[128].mxu0 }
 0x31a   :  { %v2672_v26 = vadd.f32 %v3811_v54, %v4903_v16  ;;  %v2663_v28 = vpop.f32.mrb[129].mxu0 }
 0x31b   :  { %v2664_v58 = vadd.f32 %v4903_v16, %v2663_v28  ;;  %v3812_v62 = vpop.f32.mrb[130].mxu0 }
 0x31c   :  { %2984 = vst [vmem:[#allocation2 + $0x210] sm:$0xff] %v2672_v26  ;;  %v2675_v0 = vadd.f32 %v3812_v62, %v4903_v16  ;;  %v2666_v35 = vpop.f32.mrb[131].mxu0 }
 0x31d   :  { %2982 = vst [vmem:[#allocation2 + $0x200] sm:$0xff] %v2664_v58  ;;  %v2667_v37 = vadd.f32 %v4903_v16, %v2666_v35 }
 0x31e   :  { %2985 = vst [vmem:[#allocation2 + $0x218] sm:$0xff] %v2675_v0 }
 0x31f   :  { %2983 = vst [vmem:[#allocation2 + $0x208] sm:$0xff] %v2667_v37 }
 0x321   :  { %v3815_v10 = vpop.f32.mrb[132].mxu0 }
 0x322   :  { %v2688_v12 = vadd.f32 %v3815_v10, %v4903_v16  ;;  %v2679_v53 = vpop.f32.mrb[133].mxu0 }
 0x323   :  { %v2680_v57 = vadd.f32 %v4903_v16, %v2679_v53  ;;  %v3816_v36 = vpop.f32.mrb[134].mxu0 }
 0x324   :  { %2988 = vst [vmem:[#allocation2 + $0x230] sm:$0xff] %v2688_v12  ;;  %v2691_v13 = vadd.f32 %v3816_v36, %v4903_v16  ;;  %v2682_v15 = vpop.f32.mrb[135].mxu0 }
 0x325   :  { %2986 = vst [vmem:[#allocation2 + $0x220] sm:$0xff] %v2680_v57  ;;  %v2683_v22 = vadd.f32 %v4903_v16, %v2682_v15 }
 0x326   :  { %2989 = vst [vmem:[#allocation2 + $0x238] sm:$0xff] %v2691_v13 }
 0x327   :  { %2987 = vst [vmem:[#allocation2 + $0x228] sm:$0xff] %v2683_v22 }
 0x329   :  { %v3819_v24 = vpop.f32.mrb[136].mxu0 }
 0x32a   :  { %v2704_v25 = vadd.f32 %v3819_v24, %v4903_v16  ;;  %v2695_v27 = vpop.f32.mrb[137].mxu0 }
 0x32b   :  { %v2696_v29 = vadd.f32 %v4903_v16, %v2695_v27  ;;  %v3820_v30 = vpop.f32.mrb[138].mxu0 }
 0x32c   :  { %2992 = vst [vmem:[#allocation2 + $0x250] sm:$0xff] %v2704_v25  ;;  %v2707_v31 = vadd.f32 %v3820_v30, %v4903_v16  ;;  %v2698_v32 = vpop.f32.mrb[139].mxu0 }
 0x32d   :  { %2990 = vst [vmem:[#allocation2 + $0x240] sm:$0xff] %v2696_v29  ;;  %v2699_v34 = vadd.f32 %v4903_v16, %v2698_v32 }
 0x32e   :  { %2993 = vst [vmem:[#allocation2 + $0x258] sm:$0xff] %v2707_v31 }
 0x32f   :  { %2991 = vst [vmem:[#allocation2 + $0x248] sm:$0xff] %v2699_v34 }
 0x331   :  { %v3823_v33 = vpop.f32.mrb[140].mxu0 }
 0x332   :  { %v2720_v38 = vadd.f32 %v3823_v33, %v4903_v16  ;;  %v2711_v18 = vpop.f32.mrb[141].mxu0 }
 0x333   :  { %v2712_v39 = vadd.f32 %v4903_v16, %v2711_v18  ;;  %v3824_v40 = vpop.f32.mrb[142].mxu0 }
 0x334   :  { %2996 = vst [vmem:[#allocation2 + $0x270] sm:$0xff] %v2720_v38  ;;  %v2723_v41 = vadd.f32 %v3824_v40, %v4903_v16  ;;  %v2714_v42 = vpop.f32.mrb[143].mxu0 }
 0x335   :  { %2994 = vst [vmem:[#allocation2 + $0x260] sm:$0xff] %v2712_v39  ;;  %v2715_v43 = vadd.f32 %v4903_v16, %v2714_v42 }
 0x336   :  { %2997 = vst [vmem:[#allocation2 + $0x278] sm:$0xff] %v2723_v41 }
 0x337   :  { %2995 = vst [vmem:[#allocation2 + $0x268] sm:$0xff] %v2715_v43 }
 0x339   :  { %v3827_v44 = vpop.f32.mrb[144].mxu0 }
 0x33a   :  { %v2736_v45 = vadd.f32 %v3827_v44, %v4903_v16  ;;  %v2727_v46 = vpop.f32.mrb[145].mxu0 }
 0x33b   :  { %v2728_v59 = vadd.f32 %v4903_v16, %v2727_v46  ;;  %v3828_v60 = vpop.f32.mrb[146].mxu0 }
 0x33c   :  { %3000 = vst [vmem:[#allocation2 + $0x290] sm:$0xff] %v2736_v45  ;;  %v2739_v61 = vadd.f32 %v3828_v60, %v4903_v16  ;;  %v2730_v14 = vpop.f32.mrb[147].mxu0 }
 0x33d   :  { %2998 = vst [vmem:[#allocation2 + $0x280] sm:$0xff] %v2728_v59  ;;  %v2731_v63 = vadd.f32 %v4903_v16, %v2730_v14 }
 0x33e   :  { %3001 = vst [vmem:[#allocation2 + $0x298] sm:$0xff] %v2739_v61 }
 0x33f   :  { %2999 = vst [vmem:[#allocation2 + $0x288] sm:$0xff] %v2731_v63 }
 0x341   :  { %v3831_v55 = vpop.f32.mrb[148].mxu0 }
 0x342   :  { %v2752_v1 = vadd.f32 %v3831_v55, %v4903_v16  ;;  %v2743_v2 = vpop.f32.mrb[149].mxu0 }
 0x343   :  { %v2744_v3 = vadd.f32 %v4903_v16, %v2743_v2  ;;  %v3832_v4 = vpop.f32.mrb[150].mxu0 }
 0x344   :  { %3004 = vst [vmem:[#allocation2 + $0x2b0] sm:$0xff] %v2752_v1  ;;  %v2755_v5 = vadd.f32 %v3832_v4, %v4903_v16  ;;  %v2746_v6 = vpop.f32.mrb[151].mxu0 }
 0x345   :  { %3002 = vst [vmem:[#allocation2 + $0x2a0] sm:$0xff] %v2744_v3  ;;  %v2747_v8 = vadd.f32 %v4903_v16, %v2746_v6 }
 0x346   :  { %3005 = vst [vmem:[#allocation2 + $0x2b8] sm:$0xff] %v2755_v5 }
 0x347   :  { %3003 = vst [vmem:[#allocation2 + $0x2a8] sm:$0xff] %v2747_v8 }
 0x349   :  { %v3835_v9 = vpop.f32.mrb[152].mxu0 }
 0x34a   :  { %v2768_v56 = vadd.f32 %v3835_v9, %v4903_v16  ;;  %v2759_v21 = vpop.f32.mrb[153].mxu0 }
 0x34b   :  { %v2760_v23 = vadd.f32 %v4903_v16, %v2759_v21  ;;  %v3836_v48 = vpop.f32.mrb[154].mxu0 }
 0x34c   :  { %3008 = vst [vmem:[#allocation2 + $0x2d0] sm:$0xff] %v2768_v56  ;;  %v2771_v49 = vadd.f32 %v3836_v48, %v4903_v16  ;;  %v2762_v11 = vpop.f32.mrb[155].mxu0 }
 0x34d   :  { %3006 = vst [vmem:[#allocation2 + $0x2c0] sm:$0xff] %v2760_v23  ;;  %v2763_v7 = vadd.f32 %v4903_v16, %v2762_v11 }
 0x34e   :  { %3009 = vst [vmem:[#allocation2 + $0x2d8] sm:$0xff] %v2771_v49 }
 0x34f   :  { %3007 = vst [vmem:[#allocation2 + $0x2c8] sm:$0xff] %v2763_v7 }
 0x351   :  { %v3839_v51 = vpop.f32.mrb[156].mxu0 }
 0x352   :  { %v2784_v17 = vadd.f32 %v3839_v51, %v4903_v16  ;;  %v2775_v19 = vpop.f32.mrb[157].mxu0 }
 0x353   :  { %v2776_v47 = vadd.f32 %v4903_v16, %v2775_v19  ;;  %v3840_v50 = vpop.f32.mrb[158].mxu0 }
 0x354   :  { %3012 = vst [vmem:[#allocation2 + $0x2f0] sm:$0xff] %v2784_v17  ;;  %v2787_v20 = vadd.f32 %v3840_v50, %v4903_v16  ;;  %v2778_v52 = vpop.f32.mrb[159].mxu0 }
 0x355   :  { %3010 = vst [vmem:[#allocation2 + $0x2e0] sm:$0xff] %v2776_v47  ;;  %v2779_v54 = vadd.f32 %v4903_v16, %v2778_v52 }
 0x356   :  { %3013 = vst [vmem:[#allocation2 + $0x2f8] sm:$0xff] %v2787_v20 }
 0x357   :  { %3011 = vst [vmem:[#allocation2 + $0x2e8] sm:$0xff] %v2779_v54 }
 0x359   :  { %v3843_v26 = vpop.f32.mrb[160].mxu0 }
 0x35a   :  { %v2800_v28 = vadd.f32 %v3843_v26, %v4903_v16  ;;  %v2791_v58 = vpop.f32.mrb[161].mxu0 }
 0x35b   :  { %v2792_v62 = vadd.f32 %v4903_v16, %v2791_v58  ;;  %v3844_v0 = vpop.f32.mrb[162].mxu0 }
 0x35c   :  { %3016 = vst [vmem:[#allocation2 + $0x310] sm:$0xff] %v2800_v28  ;;  %v2803_v35 = vadd.f32 %v3844_v0, %v4903_v16  ;;  %v2794_v37 = vpop.f32.mrb[163].mxu0 }
 0x35d   :  { %3014 = vst [vmem:[#allocation2 + $0x300] sm:$0xff] %v2792_v62  ;;  %v2795_v10 = vadd.f32 %v4903_v16, %v2794_v37 }
 0x35e   :  { %3017 = vst [vmem:[#allocation2 + $0x318] sm:$0xff] %v2803_v35 }
 0x35f   :  { %3015 = vst [vmem:[#allocation2 + $0x308] sm:$0xff] %v2795_v10 }
 0x361   :  { %v3847_v12 = vpop.f32.mrb[164].mxu0 }
 0x362   :  { %v2816_v53 = vadd.f32 %v3847_v12, %v4903_v16  ;;  %v2807_v57 = vpop.f32.mrb[165].mxu0 }
 0x363   :  { %v2808_v36 = vadd.f32 %v4903_v16, %v2807_v57  ;;  %v3848_v13 = vpop.f32.mrb[166].mxu0 }
 0x364   :  { %3020 = vst [vmem:[#allocation2 + $0x330] sm:$0xff] %v2816_v53  ;;  %v2819_v15 = vadd.f32 %v3848_v13, %v4903_v16  ;;  %v2810_v22 = vpop.f32.mrb[167].mxu0 }
 0x365   :  { %3018 = vst [vmem:[#allocation2 + $0x320] sm:$0xff] %v2808_v36  ;;  %v2811_v24 = vadd.f32 %v4903_v16, %v2810_v22 }
 0x366   :  { %3021 = vst [vmem:[#allocation2 + $0x338] sm:$0xff] %v2819_v15 }
 0x367   :  { %3019 = vst [vmem:[#allocation2 + $0x328] sm:$0xff] %v2811_v24 }
 0x369   :  { %v3851_v25 = vpop.f32.mrb[168].mxu0 }
 0x36a   :  { %v2832_v27 = vadd.f32 %v3851_v25, %v4903_v16  ;;  %v2823_v29 = vpop.f32.mrb[169].mxu0 }
 0x36b   :  { %v2824_v30 = vadd.f32 %v4903_v16, %v2823_v29  ;;  %v3852_v31 = vpop.f32.mrb[170].mxu0 }
 0x36c   :  { %3024 = vst [vmem:[#allocation2 + $0x350] sm:$0xff] %v2832_v27  ;;  %v2835_v32 = vadd.f32 %v3852_v31, %v4903_v16  ;;  %v2826_v34 = vpop.f32.mrb[171].mxu0 }
 0x36d   :  { %3022 = vst [vmem:[#allocation2 + $0x340] sm:$0xff] %v2824_v30  ;;  %v2827_v33 = vadd.f32 %v4903_v16, %v2826_v34 }
 0x36e   :  { %3025 = vst [vmem:[#allocation2 + $0x358] sm:$0xff] %v2835_v32 }
 0x36f   :  { %3023 = vst [vmem:[#allocation2 + $0x348] sm:$0xff] %v2827_v33 }
 0x371   :  { %v3855_v38 = vpop.f32.mrb[172].mxu0 }
 0x372   :  { %v2848_v18 = vadd.f32 %v3855_v38, %v4903_v16  ;;  %v2839_v39 = vpop.f32.mrb[173].mxu0 }
 0x373   :  { %v2840_v40 = vadd.f32 %v4903_v16, %v2839_v39  ;;  %v3856_v41 = vpop.f32.mrb[174].mxu0 }
 0x374   :  { %3028 = vst [vmem:[#allocation2 + $0x370] sm:$0xff] %v2848_v18  ;;  %v2851_v42 = vadd.f32 %v3856_v41, %v4903_v16  ;;  %v2842_v43 = vpop.f32.mrb[175].mxu0 }
 0x375   :  { %3026 = vst [vmem:[#allocation2 + $0x360] sm:$0xff] %v2840_v40  ;;  %v2843_v44 = vadd.f32 %v4903_v16, %v2842_v43 }
 0x376   :  { %3029 = vst [vmem:[#allocation2 + $0x378] sm:$0xff] %v2851_v42 }
 0x377   :  { %3027 = vst [vmem:[#allocation2 + $0x368] sm:$0xff] %v2843_v44 }
 0x379   :  { %v3859_v45 = vpop.f32.mrb[176].mxu0 }
 0x37a   :  { %v2864_v46 = vadd.f32 %v3859_v45, %v4903_v16  ;;  %v2855_v59 = vpop.f32.mrb[177].mxu0 }
 0x37b   :  { %v2856_v60 = vadd.f32 %v4903_v16, %v2855_v59  ;;  %v3860_v61 = vpop.f32.mrb[178].mxu0 }
 0x37c   :  { %3032 = vst [vmem:[#allocation2 + $0x390] sm:$0xff] %v2864_v46  ;;  %v2867_v14 = vadd.f32 %v3860_v61, %v4903_v16  ;;  %v2858_v63 = vpop.f32.mrb[179].mxu0 }
 0x37d   :  { %3030 = vst [vmem:[#allocation2 + $0x380] sm:$0xff] %v2856_v60  ;;  %v2859_v55 = vadd.f32 %v4903_v16, %v2858_v63 }
 0x37e   :  { %3033 = vst [vmem:[#allocation2 + $0x398] sm:$0xff] %v2867_v14 }
 0x37f   :  { %3031 = vst [vmem:[#allocation2 + $0x388] sm:$0xff] %v2859_v55 }
 0x381   :  { %v3863_v1 = vpop.f32.mrb[180].mxu0 }
 0x382   :  { %v2880_v2 = vadd.f32 %v3863_v1, %v4903_v16  ;;  %v2871_v3 = vpop.f32.mrb[181].mxu0 }
 0x383   :  { %v2872_v4 = vadd.f32 %v4903_v16, %v2871_v3  ;;  %v3864_v5 = vpop.f32.mrb[182].mxu0 }
 0x384   :  { %3036 = vst [vmem:[#allocation2 + $0x3b0] sm:$0xff] %v2880_v2  ;;  %v2883_v6 = vadd.f32 %v3864_v5, %v4903_v16  ;;  %v2874_v8 = vpop.f32.mrb[183].mxu0 }
 0x385   :  { %3034 = vst [vmem:[#allocation2 + $0x3a0] sm:$0xff] %v2872_v4  ;;  %v2875_v9 = vadd.f32 %v4903_v16, %v2874_v8 }
 0x386   :  { %3037 = vst [vmem:[#allocation2 + $0x3b8] sm:$0xff] %v2883_v6 }
 0x387   :  { %3035 = vst [vmem:[#allocation2 + $0x3a8] sm:$0xff] %v2875_v9 }
 0x389   :  { %v3867_v56 = vpop.f32.mrb[184].mxu0 }
 0x38a   :  { %v2896_v21 = vadd.f32 %v3867_v56, %v4903_v16  ;;  %v2887_v23 = vpop.f32.mrb[185].mxu0 }
 0x38b   :  { %v2888_v48 = vadd.f32 %v4903_v16, %v2887_v23  ;;  %v3868_v49 = vpop.f32.mrb[186].mxu0 }
 0x38c   :  { %3040 = vst [vmem:[#allocation2 + $0x3d0] sm:$0xff] %v2896_v21  ;;  %v2899_v11 = vadd.f32 %v3868_v49, %v4903_v16  ;;  %v2890_v7 = vpop.f32.mrb[187].mxu0 }
 0x38d   :  { %3038 = vst [vmem:[#allocation2 + $0x3c0] sm:$0xff] %v2888_v48  ;;  %v2891_v51 = vadd.f32 %v4903_v16, %v2890_v7 }
 0x38e   :  { %3041 = vst [vmem:[#allocation2 + $0x3d8] sm:$0xff] %v2899_v11 }
 0x38f   :  { %3039 = vst [vmem:[#allocation2 + $0x3c8] sm:$0xff] %v2891_v51 }
 0x391   :  { %v3871_v17 = vpop.f32.mrb[188].mxu0 }
 0x392   :  { %v2912_v19 = vadd.f32 %v3871_v17, %v4903_v16  ;;  %v2903_v47 = vpop.f32.mrb[189].mxu0 }
 0x393   :  { %v2904_v50 = vadd.f32 %v4903_v16, %v2903_v47  ;;  %v3872_v20 = vpop.f32.mrb[190].mxu0 }
 0x394   :  { %3044 = vst [vmem:[#allocation2 + $0x3f0] sm:$0xff] %v2912_v19  ;;  %v2915_v52 = vadd.f32 %v3872_v20, %v4903_v16  ;;  %v2906_v54 = vpop.f32.mrb[191].mxu0 }
 0x395   :  { %3042 = vst [vmem:[#allocation2 + $0x3e0] sm:$0xff] %v2904_v50  ;;  %v2907_v26 = vadd.f32 %v4903_v16, %v2906_v54 }
 0x396   :  { %3045 = vst [vmem:[#allocation2 + $0x3f8] sm:$0xff] %v2915_v52 }
 0x397   :  { %3043 = vst [vmem:[#allocation2 + $0x3e8] sm:$0xff] %v2907_v26 }
 0x398   :  { %3902 = shalt.err (!%p3899_p4)
}
 0x399   :  { %s3903_s1 = scalar_lea.hbm %s5073_s7, 16384 }
 0x39a   :  { %p3904_p5 = scmp.ne.s32.totalorder %s5073_s7, %s3903_s1  ;;  %p3907_p6 = scmp.lt.u32.totalorder %s3903_s1, %s5073_s7 }
 0x39c   :  { %p3909_p7 = pnand %p3907_p6, %p3904_p5 }
 0x39e   :  { %3912 = shalt.err (!%p3909_p7)
}
 0x39f   :  { %s3916_s17 = smov 128   ;;  %s3917_s18 = smov 8  }
 0x3a0   :  { %3057 = dma.vmem_to_hbm [thread:$0]  %s3052_s10, 16384, %s5073_s7, [#allocation3], %s3916_s17, %s3916_s17, %s3917_s18  }
 0x3a1   :  { %3913 = dma.done.wait [#allocation3], 16384  }
 0x3a2   :  { %3914 = vsyncadd [#allocation3], 4294950912 }
 0x3a3   :  { %3061 = vsyncpa [#allocation3], 1 }

</bundles_post_ra>
